<compile_context>
chip_gen: v7x
topology: tpu7x:2x2x1
jax: 0.10.0
libtpu: 0.0.40
codegen_flags: <defaults>
</compile_context>

<pallas_src>
import functools

import jax
import jax.numpy as jnp
from jax.experimental import pallas as pl
from jax.experimental.pallas import tpu as pltpu

EPS = 1e-5
LANES = 128


# ---------------------------------------------------------------------------
# Kernel A: fused im2col conv (sum over kh*kw taps on the MXU) + per-sample BN stats
# ---------------------------------------------------------------------------
def _conv_stats_kernel(x_ref, w_ref, mask_ref, y_ref, stats_ref, *,
                       tap_offsets, stride, n_rows, inv_count):
    # x_ref:     (rows_in, Cin) f32  flattened NHWC rows of one sample (zero-padded tail)
    # w_ref:     (kh*kw, Cin, Cp) bf16
    # mask_ref:  (n_rows, 1) f32    1.0 where the extended output column is valid (wo < Wo)
    # y_ref:     (n_rows, Cp) bf16  extended conv output (W columns per output row)
    # stats_ref: (2, Cp) f32        row0 = per-sample sum, row1 = per-sample centered M2
    acc = None
    for t, off in enumerate(tap_offsets):
        if stride == 1:
            xs = x_ref[off:off + n_rows, :]
        else:
            xs = x_ref[pl.ds(off, n_rows, stride=stride), :]
        part = jnp.dot(xs.astype(jnp.bfloat16), w_ref[t],
                       preferred_element_type=jnp.float32)
        acc = part if acc is None else acc + part

    # bf16 round-trip between the two passes (stats still taken from the f32 accumulator).
    y_ref[...] = acc.astype(y_ref.dtype)

    mask = mask_ref[...]                                    # (n_rows, 1), lane-broadcast
    s = jnp.sum(acc * mask, axis=0, keepdims=True)          # (1, Cp) per-sample sum
    mean = s * inv_count
    d = acc - mean
    m2 = jnp.sum(d * d * mask, axis=0, keepdims=True)       # (1, Cp) centered 2nd moment
    stats_ref[0:1, :] = s
    stats_ref[1:2, :] = m2


# ---------------------------------------------------------------------------
# Kernel B: normalize (pre-folded scale/shift) + ReLU
# ---------------------------------------------------------------------------
def _bn_relu_kernel(y_ref, ss_ref, o_ref):
    # y_ref: (n_rows, Cp) bf16;  ss_ref: (2, Cp) f32 (row0=scale, row1=shift)
    scale = ss_ref[0:1, :]
    shift = ss_ref[1:2, :]
    y = y_ref[...].astype(jnp.float32)
    o_ref[...] = jnp.maximum(y * scale + shift, 0.0).astype(o_ref.dtype)


# ---------------------------------------------------------------------------
# Per-generation scoped-VMEM limit (v7x: 64 MiB physical; v5e/v6e: 128 MiB)
# ---------------------------------------------------------------------------
def _vmem_limit_bytes():
    try:
        cap = int(pltpu.get_tpu_info().vmem_capacity_bytes)
        return min((cap * 3) // 4, 96 * 1024 * 1024)
    except Exception:
        return None


def _compiler_params():
    kwargs = dict(dimension_semantics=("parallel",))
    limit = _vmem_limit_bytes()
    if limit is not None:
        kwargs["vmem_limit_bytes"] = limit
    return pltpu.CompilerParams(**kwargs)


# ---------------------------------------------------------------------------
# Wrapper: BasicBlock forward (training-mode BatchNorm statistics)
# ---------------------------------------------------------------------------
def basic_block_forward(x_nchw, weight_oihw, bias, gamma, beta, *, stride=1):
    """x: (N,Cin,H,W) f32, weight: (Cout,Cin,kh,kw), bias/gamma/beta: (Cout,) -> (N,Cout,Ho,Wo).

    `bias` is accepted for interface parity with the PyTorch module but not added: a
    per-channel constant before training-mode BatchNorm is exactly cancelled by the
    batch-mean subtraction.
    """
    del bias

    N, Cin, H, W = map(int, x_nchw.shape)
    Cout, _, kh, kw = map(int, weight_oihw.shape)
    s = int(stride)
    Ho = (H - kh) // s + 1
    Wo = (W - kw) // s + 1
    M = N * Ho * Wo                         # real output pixels (BN count)
    count = Ho * Wo                         # valid pixels per sample
    Cp = pl.cdiv(Cout, LANES) * LANES       # lane-dense channel dim

    n_rows = Ho * W                         # extended output rows/sample (W cols per row)
    rows_need = s * (n_rows - 1) + (kh - 1) * W + kw
    rows_in = max(H * W, rows_need)
    tap_offsets = tuple(i * W + j for i in range(kh) for j in range(kw))

    # --- glue: NCHW -> flattened NHWC rows (the kernel reads the input exactly once) ---
    x_rows = jnp.transpose(x_nchw, (0, 2, 3, 1)).reshape(N, H * W, Cin).astype(jnp.float32)
    if rows_in > H * W:
        x_rows = jnp.pad(x_rows, ((0, 0), (0, rows_in - H * W), (0, 0)))

    w_taps = jnp.transpose(weight_oihw, (2, 3, 1, 0)).reshape(kh * kw, Cin, Cout)
    w_taps = jnp.pad(w_taps, ((0, 0), (0, 0), (0, Cp - Cout))).astype(jnp.bfloat16)

    col_mask = (jnp.arange(n_rows, dtype=jnp.int32) % W < Wo)
    col_mask = col_mask.astype(jnp.float32).reshape(n_rows, 1)

    cparams = _compiler_params()
    kernel_a = functools.partial(
        _conv_stats_kernel, tap_offsets=tap_offsets, stride=s,
        n_rows=n_rows, inv_count=1.0 / count)

    # --- pass 1: fused conv (MXU) + per-sample BN partial statistics ---
    y_ext, stats = pl.pallas_call(
        kernel_a,
        grid=(N,),
        out_shape=(
            jax.ShapeDtypeStruct((N, n_rows, Cp), jnp.bfloat16),
            jax.ShapeDtypeStruct((N, 2, Cp), jnp.float32),
        ),
        in_specs=[
            pl.BlockSpec((None, rows_in, Cin), lambda n: (n, 0, 0)),
            pl.BlockSpec((kh * kw, Cin, Cp), lambda n: (0, 0, 0)),
            pl.BlockSpec((n_rows, 1), lambda n: (0, 0)),
        ],
        out_specs=(
            pl.BlockSpec((None, n_rows, Cp), lambda n: (n, 0, 0)),
            pl.BlockSpec((None, 2, Cp), lambda n: (n, 0, 0)),
        ),
        compiler_params=cparams,
        cost_estimate=pl.CostEstimate(
            flops=2 * N * n_rows * kh * kw * Cin * Cp,
            transcendentals=0,
            bytes_accessed=(N * rows_in * Cin * 4 + kh * kw * Cin * Cp * 2
                            + N * n_rows * Cp * 2 + N * 2 * Cp * 4),
        ),
    )(x_rows, w_taps, col_mask)

    # --- finalize BN statistics: Chan parallel-variance merge (tiny per-channel math) ---
    s_n = stats[:, 0, :]                                 # (N, Cp) per-sample sums
    m2_n = stats[:, 1, :]                                # (N, Cp) per-sample centered M2
    mean = jnp.sum(s_n, axis=0) / M                      # (Cp,) global mean
    mean_n = s_n / count
    m2 = jnp.sum(m2_n, axis=0) + count * jnp.sum((mean_n - mean) ** 2, axis=0)
    var = jnp.maximum(m2 / M, 0.0)                       # biased variance (BN train mode)
    inv_std = jax.lax.rsqrt(var + EPS)
    gamma_p = jnp.pad(gamma.astype(jnp.float32), (0, Cp - Cout))
    beta_p = jnp.pad(beta.astype(jnp.float32), (0, Cp - Cout))
    scale = gamma_p * inv_std
    shift = beta_p - mean * scale
    ss = jnp.stack([scale, shift], axis=0)               # (2, Cp)

    # --- pass 2: normalize + ReLU on whole-sample lane-dense blocks ---
    out_ext = pl.pallas_call(
        _bn_relu_kernel,
        grid=(N,),
        out_shape=jax.ShapeDtypeStruct((N, n_rows, Cp), jnp.float32),
        in_specs=[
            pl.BlockSpec((None, n_rows, Cp), lambda n: (n, 0, 0)),
            pl.BlockSpec((2, Cp), lambda n: (0, 0)),
        ],
        out_specs=pl.BlockSpec((None, n_rows, Cp), lambda n: (n, 0, 0)),
        compiler_params=cparams,
        cost_estimate=pl.CostEstimate(
            flops=2 * N * n_rows * Cp,
            transcendentals=0,
            bytes_accessed=N * n_rows * Cp * 2 + N * n_rows * Cp * 4 + 2 * Cp * 4,
        ),
    )(y_ext, ss)

    # --- glue: drop extended columns / padded channels, back to NCHW ---
    out = out_ext.reshape(N, Ho, W, Cp)[:, :, :Wo, :Cout]
    return jnp.transpose(out, (0, 3, 1, 2))


# ---------------------------------------------------------------------------
# Reference (pure JAX) with matching numerics (bf16 conv operands, f32 accumulate)
# ---------------------------------------------------------------------------
def _reference_forward(x_nchw, weight_oihw, bias, gamma, beta, *, stride=1):
    y = jax.lax.conv_general_dilated(
        x_nchw.astype(jnp.bfloat16), weight_oihw.astype(jnp.bfloat16),
        window_strides=(stride, stride), padding="VALID",
        dimension_numbers=("NCHW", "OIHW", "NCHW"),
        preferred_element_type=jnp.float32,
    ) + bias.reshape(1, -1, 1, 1)
    mean = jnp.mean(y, axis=(0, 2, 3), keepdims=True)
    var = jnp.mean((y - mean) ** 2, axis=(0, 2, 3), keepdims=True)
    yn = (y - mean) * jax.lax.rsqrt(var + EPS)
    yn = yn * gamma.reshape(1, -1, 1, 1) + beta.reshape(1, -1, 1, 1)
    return jnp.maximum(yn, 0.0)


if __name__ == "__main__":
    # Small shapes consistent with the module: N=2, in_dim=4, H=W=16, dim=8, k=3, stride=1.
    key = jax.random.PRNGKey(0)
    k_x, k_w, k_b, k_g, k_bt = jax.random.split(key, 5)

    N, in_dim, H, W = 2, 4, 16, 16
    dim, ksize, stride = 8, 3, 1

    x = jax.random.normal(k_x, (N, in_dim, H, W), dtype=jnp.float32)
    weight = 0.1 * jax.random.normal(k_w, (dim, in_dim, ksize, ksize), dtype=jnp.float32)
    bias = 0.1 * jax.random.normal(k_b, (dim,), dtype=jnp.float32)
    gamma = 1.0 + 0.1 * jax.random.normal(k_g, (dim,), dtype=jnp.float32)
    beta = 0.1 * jax.random.normal(k_bt, (dim,), dtype=jnp.float32)

    out = basic_block_forward(x, weight, bias, gamma, beta, stride=stride)
    out = jax.block_until_ready(out)

    ref = jax.block_until_ready(
        _reference_forward(x, weight, bias, gamma, beta, stride=stride)
    )
    assert out.shape == (N, dim, H - ksize + 1, W - ksize + 1), out.shape
    err = float(jnp.max(jnp.abs(out - ref)))
    # Tolerance covers the intentional bf16 storage of the intermediate conv output.
    assert jnp.allclose(out, ref, atol=2e-2, rtol=2e-2), err

    print("KERNEL_OK")
</pallas_src>

<mosaic_0001>
module attributes {stable_mosaic.version = 11 : i64} {
  func.func @_conv_stats_kernel(%arg0: i32, %arg1: memref<1x258x4xf32, #tpu.memory_space<vmem>>, %arg2: memref<9x4x128xbf16, #tpu.memory_space<vmem>>, %arg3: memref<224x1xf32, #tpu.memory_space<vmem>>, %arg4: memref<1x224x128xbf16, #tpu.memory_space<vmem>>, %arg5: memref<1x2x128xf32, #tpu.memory_space<vmem>>) attributes {dimension_semantics = [#tpu.dimension_semantics<parallel>], iteration_bounds = array<i64: 2>, scalar_prefetch = 0 : i64, scratch_operands = 0 : i64, tpu.core_type = #tpu.core_type<tc>, window_params = [{transform_indices = @transform_0, window_bounds = array<i64: 1, 258, 4>}, {pipeline_mode = #tpu.pipeline_mode<synchronous>, transform_indices = @transform_1, window_bounds = array<i64: 9, 4, 128>}, {pipeline_mode = #tpu.pipeline_mode<synchronous>, transform_indices = @transform_2, window_bounds = array<i64: 224, 1>}, {transform_indices = @transform_3, window_bounds = array<i64: 1, 224, 128>}, {transform_indices = @transform_4, window_bounds = array<i64: 1, 2, 128>}]} {
    %c0 = arith.constant 0 : index
    %c0_0 = arith.constant 0 : index
    %c0_1 = arith.constant 0 : index
    %0 = vector.load %arg1[%c0, %c0_0, %c0_1] : memref<1x258x4xf32, #tpu.memory_space<vmem>>, vector<1x224x4xf32>
    %1 = vector.shape_cast %0 : vector<1x224x4xf32> to vector<224x4xf32>
    %2 = arith.truncf %1 : vector<224x4xf32> to vector<224x4xbf16>
    %c0_2 = arith.constant 0 : index
    %c0_3 = arith.constant 0 : index
    %c0_4 = arith.constant 0 : index
    %3 = vector.load %arg2[%c0_2, %c0_3, %c0_4] : memref<9x4x128xbf16, #tpu.memory_space<vmem>>, vector<1x4x128xbf16>
    %4 = vector.shape_cast %3 : vector<1x4x128xbf16> to vector<4x128xbf16>
    %cst = arith.constant dense<0.000000e+00> : vector<224x128xf32>
    %5 = tpu.matmul %2, %4, %cst {dimension_numbers = #tpu.dot_dimension_numbers<[1], [0], [0], [1], [0, 0, 1, 1], [], []>} : vector<224x4xbf16>, vector<4x128xbf16>, vector<224x128xf32> -> vector<224x128xf32>
    %c0_5 = arith.constant 0 : index
    %c1 = arith.constant 1 : index
    %c0_6 = arith.constant 0 : index
    %6 = vector.load %arg1[%c0_5, %c1, %c0_6] : memref<1x258x4xf32, #tpu.memory_space<vmem>>, vector<1x224x4xf32>
    %7 = vector.shape_cast %6 : vector<1x224x4xf32> to vector<224x4xf32>
    %8 = arith.truncf %7 : vector<224x4xf32> to vector<224x4xbf16>
    %c1_7 = arith.constant 1 : index
    %c0_8 = arith.constant 0 : index
    %c0_9 = arith.constant 0 : index
    %9 = vector.load %arg2[%c1_7, %c0_8, %c0_9] : memref<9x4x128xbf16, #tpu.memory_space<vmem>>, vector<1x4x128xbf16>
    %10 = vector.shape_cast %9 : vector<1x4x128xbf16> to vector<4x128xbf16>
    %cst_10 = arith.constant dense<0.000000e+00> : vector<224x128xf32>
    %11 = tpu.matmul %8, %10, %cst_10 {dimension_numbers = #tpu.dot_dimension_numbers<[1], [0], [0], [1], [0, 0, 1, 1], [], []>} : vector<224x4xbf16>, vector<4x128xbf16>, vector<224x128xf32> -> vector<224x128xf32>
    %12 = arith.addf %5, %11 : vector<224x128xf32>
    %c0_11 = arith.constant 0 : index
    %c2 = arith.constant 2 : index
    %c0_12 = arith.constant 0 : index
    %13 = vector.load %arg1[%c0_11, %c2, %c0_12] : memref<1x258x4xf32, #tpu.memory_space<vmem>>, vector<1x224x4xf32>
    %14 = vector.shape_cast %13 : vector<1x224x4xf32> to vector<224x4xf32>
    %15 = arith.truncf %14 : vector<224x4xf32> to vector<224x4xbf16>
    %c2_13 = arith.constant 2 : index
    %c0_14 = arith.constant 0 : index
    %c0_15 = arith.constant 0 : index
    %16 = vector.load %arg2[%c2_13, %c0_14, %c0_15] : memref<9x4x128xbf16, #tpu.memory_space<vmem>>, vector<1x4x128xbf16>
    %17 = vector.shape_cast %16 : vector<1x4x128xbf16> to vector<4x128xbf16>
    %cst_16 = arith.constant dense<0.000000e+00> : vector<224x128xf32>
    %18 = tpu.matmul %15, %17, %cst_16 {dimension_numbers = #tpu.dot_dimension_numbers<[1], [0], [0], [1], [0, 0, 1, 1], [], []>} : vector<224x4xbf16>, vector<4x128xbf16>, vector<224x128xf32> -> vector<224x128xf32>
    %19 = arith.addf %12, %18 : vector<224x128xf32>
    %c0_17 = arith.constant 0 : index
    %c16 = arith.constant 16 : index
    %c0_18 = arith.constant 0 : index
    %20 = vector.load %arg1[%c0_17, %c16, %c0_18] : memref<1x258x4xf32, #tpu.memory_space<vmem>>, vector<1x224x4xf32>
    %21 = vector.shape_cast %20 : vector<1x224x4xf32> to vector<224x4xf32>
    %22 = arith.truncf %21 : vector<224x4xf32> to vector<224x4xbf16>
    %c3 = arith.constant 3 : index
    %c0_19 = arith.constant 0 : index
    %c0_20 = arith.constant 0 : index
    %23 = vector.load %arg2[%c3, %c0_19, %c0_20] : memref<9x4x128xbf16, #tpu.memory_space<vmem>>, vector<1x4x128xbf16>
    %24 = vector.shape_cast %23 : vector<1x4x128xbf16> to vector<4x128xbf16>
    %cst_21 = arith.constant dense<0.000000e+00> : vector<224x128xf32>
    %25 = tpu.matmul %22, %24, %cst_21 {dimension_numbers = #tpu.dot_dimension_numbers<[1], [0], [0], [1], [0, 0, 1, 1], [], []>} : vector<224x4xbf16>, vector<4x128xbf16>, vector<224x128xf32> -> vector<224x128xf32>
    %26 = arith.addf %19, %25 : vector<224x128xf32>
    %c0_22 = arith.constant 0 : index
    %c17 = arith.constant 17 : index
    %c0_23 = arith.constant 0 : index
    %27 = vector.load %arg1[%c0_22, %c17, %c0_23] : memref<1x258x4xf32, #tpu.memory_space<vmem>>, vector<1x224x4xf32>
    %28 = vector.shape_cast %27 : vector<1x224x4xf32> to vector<224x4xf32>
    %29 = arith.truncf %28 : vector<224x4xf32> to vector<224x4xbf16>
    %c4 = arith.constant 4 : index
    %c0_24 = arith.constant 0 : index
    %c0_25 = arith.constant 0 : index
    %30 = vector.load %arg2[%c4, %c0_24, %c0_25] : memref<9x4x128xbf16, #tpu.memory_space<vmem>>, vector<1x4x128xbf16>
    %31 = vector.shape_cast %30 : vector<1x4x128xbf16> to vector<4x128xbf16>
    %cst_26 = arith.constant dense<0.000000e+00> : vector<224x128xf32>
    %32 = tpu.matmul %29, %31, %cst_26 {dimension_numbers = #tpu.dot_dimension_numbers<[1], [0], [0], [1], [0, 0, 1, 1], [], []>} : vector<224x4xbf16>, vector<4x128xbf16>, vector<224x128xf32> -> vector<224x128xf32>
    %33 = arith.addf %26, %32 : vector<224x128xf32>
    %c0_27 = arith.constant 0 : index
    %c18 = arith.constant 18 : index
    %c0_28 = arith.constant 0 : index
    %34 = vector.load %arg1[%c0_27, %c18, %c0_28] : memref<1x258x4xf32, #tpu.memory_space<vmem>>, vector<1x224x4xf32>
    %35 = vector.shape_cast %34 : vector<1x224x4xf32> to vector<224x4xf32>
    %36 = arith.truncf %35 : vector<224x4xf32> to vector<224x4xbf16>
    %c5 = arith.constant 5 : index
    %c0_29 = arith.constant 0 : index
    %c0_30 = arith.constant 0 : index
    %37 = vector.load %arg2[%c5, %c0_29, %c0_30] : memref<9x4x128xbf16, #tpu.memory_space<vmem>>, vector<1x4x128xbf16>
    %38 = vector.shape_cast %37 : vector<1x4x128xbf16> to vector<4x128xbf16>
    %cst_31 = arith.constant dense<0.000000e+00> : vector<224x128xf32>
    %39 = tpu.matmul %36, %38, %cst_31 {dimension_numbers = #tpu.dot_dimension_numbers<[1], [0], [0], [1], [0, 0, 1, 1], [], []>} : vector<224x4xbf16>, vector<4x128xbf16>, vector<224x128xf32> -> vector<224x128xf32>
    %40 = arith.addf %33, %39 : vector<224x128xf32>
    %c0_32 = arith.constant 0 : index
    %c32 = arith.constant 32 : index
    %c0_33 = arith.constant 0 : index
    %41 = vector.load %arg1[%c0_32, %c32, %c0_33] : memref<1x258x4xf32, #tpu.memory_space<vmem>>, vector<1x224x4xf32>
    %42 = vector.shape_cast %41 : vector<1x224x4xf32> to vector<224x4xf32>
    %43 = arith.truncf %42 : vector<224x4xf32> to vector<224x4xbf16>
    %c6 = arith.constant 6 : index
    %c0_34 = arith.constant 0 : index
    %c0_35 = arith.constant 0 : index
    %44 = vector.load %arg2[%c6, %c0_34, %c0_35] : memref<9x4x128xbf16, #tpu.memory_space<vmem>>, vector<1x4x128xbf16>
    %45 = vector.shape_cast %44 : vector<1x4x128xbf16> to vector<4x128xbf16>
    %cst_36 = arith.constant dense<0.000000e+00> : vector<224x128xf32>
    %46 = tpu.matmul %43, %45, %cst_36 {dimension_numbers = #tpu.dot_dimension_numbers<[1], [0], [0], [1], [0, 0, 1, 1], [], []>} : vector<224x4xbf16>, vector<4x128xbf16>, vector<224x128xf32> -> vector<224x128xf32>
    %47 = arith.addf %40, %46 : vector<224x128xf32>
    %c0_37 = arith.constant 0 : index
    %c33 = arith.constant 33 : index
    %c0_38 = arith.constant 0 : index
    %48 = vector.load %arg1[%c0_37, %c33, %c0_38] : memref<1x258x4xf32, #tpu.memory_space<vmem>>, vector<1x224x4xf32>
    %49 = vector.shape_cast %48 : vector<1x224x4xf32> to vector<224x4xf32>
    %50 = arith.truncf %49 : vector<224x4xf32> to vector<224x4xbf16>
    %c7 = arith.constant 7 : index
    %c0_39 = arith.constant 0 : index
    %c0_40 = arith.constant 0 : index
    %51 = vector.load %arg2[%c7, %c0_39, %c0_40] : memref<9x4x128xbf16, #tpu.memory_space<vmem>>, vector<1x4x128xbf16>
    %52 = vector.shape_cast %51 : vector<1x4x128xbf16> to vector<4x128xbf16>
    %cst_41 = arith.constant dense<0.000000e+00> : vector<224x128xf32>
    %53 = tpu.matmul %50, %52, %cst_41 {dimension_numbers = #tpu.dot_dimension_numbers<[1], [0], [0], [1], [0, 0, 1, 1], [], []>} : vector<224x4xbf16>, vector<4x128xbf16>, vector<224x128xf32> -> vector<224x128xf32>
    %54 = arith.addf %47, %53 : vector<224x128xf32>
    %c0_42 = arith.constant 0 : index
    %c34 = arith.constant 34 : index
    %c0_43 = arith.constant 0 : index
    %55 = vector.load %arg1[%c0_42, %c34, %c0_43] : memref<1x258x4xf32, #tpu.memory_space<vmem>>, vector<1x224x4xf32>
    %56 = vector.shape_cast %55 : vector<1x224x4xf32> to vector<224x4xf32>
    %57 = arith.truncf %56 : vector<224x4xf32> to vector<224x4xbf16>
    %c8 = arith.constant 8 : index
    %c0_44 = arith.constant 0 : index
    %c0_45 = arith.constant 0 : index
    %58 = vector.load %arg2[%c8, %c0_44, %c0_45] : memref<9x4x128xbf16, #tpu.memory_space<vmem>>, vector<1x4x128xbf16>
    %59 = vector.shape_cast %58 : vector<1x4x128xbf16> to vector<4x128xbf16>
    %cst_46 = arith.constant dense<0.000000e+00> : vector<224x128xf32>
    %60 = tpu.matmul %57, %59, %cst_46 {dimension_numbers = #tpu.dot_dimension_numbers<[1], [0], [0], [1], [0, 0, 1, 1], [], []>} : vector<224x4xbf16>, vector<4x128xbf16>, vector<224x128xf32> -> vector<224x128xf32>
    %61 = arith.addf %54, %60 : vector<224x128xf32>
    %62 = arith.truncf %61 : vector<224x128xf32> to vector<224x128xbf16>
    %c0_47 = arith.constant 0 : index
    %c0_48 = arith.constant 0 : index
    %c0_49 = arith.constant 0 : index
    %63 = vector.load %arg4[%c0_47, %c0_48, %c0_49] : memref<1x224x128xbf16, #tpu.memory_space<vmem>>, vector<1x224x128xbf16>
    %64 = vector.shape_cast %63 : vector<1x224x128xbf16> to vector<224x128xbf16>
    %65 = vector.shape_cast %62 : vector<224x128xbf16> to vector<1x224x128xbf16>
    tpu.vector_store %arg4[%c0_47, %c0_48, %c0_49], %65 {strides = array<i32>} : memref<1x224x128xbf16, #tpu.memory_space<vmem>>, vector<1x224x128xbf16>,
    %c0_50 = arith.constant 0 : index
    %c0_51 = arith.constant 0 : index
    %66 = vector.load %arg3[%c0_50, %c0_51] : memref<224x1xf32, #tpu.memory_space<vmem>>, vector<224x1xf32>
    %67 = vector.broadcast %66 : vector<224x1xf32> to vector<224x128xf32>
    %68 = arith.mulf %61, %67 : vector<224x128xf32>
    %cst_52 = arith.constant dense<0.000000e+00> : vector<128xf32>
    %69 = vector.multi_reduction <add>, %68, %cst_52 [0] : vector<224x128xf32> to vector<128xf32>
    %70 = vector.shape_cast %69 : vector<128xf32> to vector<1x128xf32>
    %cst_53 = arith.constant 0.00510204071 : f32
    %71 = vector.broadcast %cst_53 : f32 to vector<1x128xf32>
    %72 = arith.mulf %70, %71 : vector<1x128xf32>
    %73 = vector.broadcast %72 : vector<1x128xf32> to vector<224x128xf32>
    %74 = arith.subf %61, %73 : vector<224x128xf32>
    %75 = arith.mulf %74, %74 : vector<224x128xf32>
    %76 = vector.broadcast %66 : vector<224x1xf32> to vector<224x128xf32>
    %77 = arith.mulf %75, %76 : vector<224x128xf32>
    %cst_54 = arith.constant dense<0.000000e+00> : vector<128xf32>
    %78 = vector.multi_reduction <add>, %77, %cst_54 [0] : vector<224x128xf32> to vector<128xf32>
    %79 = vector.shape_cast %78 : vector<128xf32> to vector<1x128xf32>
    %c0_55 = arith.constant 0 : index
    %c0_56 = arith.constant 0 : index
    %c0_57 = arith.constant 0 : index
    %80 = vector.load %arg5[%c0_55, %c0_56, %c0_57] : memref<1x2x128xf32, #tpu.memory_space<vmem>>, vector<1x1x128xf32>
    %81 = vector.shape_cast %80 : vector<1x1x128xf32> to vector<1x128xf32>
    %82 = vector.shape_cast %70 : vector<1x128xf32> to vector<1x1x128xf32>
    tpu.vector_store %arg5[%c0_55, %c0_56, %c0_57], %82 {strides = array<i32>} : memref<1x2x128xf32, #tpu.memory_space<vmem>>, vector<1x1x128xf32>,
    %c0_58 = arith.constant 0 : index
    %c1_59 = arith.constant 1 : index
    %c0_60 = arith.constant 0 : index
    %83 = vector.load %arg5[%c0_58, %c1_59, %c0_60] : memref<1x2x128xf32, #tpu.memory_space<vmem>>, vector<1x1x128xf32>
    %84 = vector.shape_cast %83 : vector<1x1x128xf32> to vector<1x128xf32>
    %85 = vector.shape_cast %79 : vector<1x128xf32> to vector<1x1x128xf32>
    tpu.vector_store %arg5[%c0_58, %c1_59, %c0_60], %85 {strides = array<i32>} : memref<1x2x128xf32, #tpu.memory_space<vmem>>, vector<1x1x128xf32>,
    return
  }
  func.func @transform_0(%arg0: i32) -> (i32, i32, i32) {
    %c0_i32 = arith.constant 0 : i32
    %c0_i32_0 = arith.constant 0 : i32
    %c0_i32_1 = arith.constant 0 : i32
    return %arg0, %c0_i32, %c0_i32_0 : i32, i32, i32
  }
  func.func @transform_1(%arg0: i32) -> (i32, i32, i32) {
    %c0_i32 = arith.constant 0 : i32
    %c0_i32_0 = arith.constant 0 : i32
    %c0_i32_1 = arith.constant 0 : i32
    %c0_i32_2 = arith.constant 0 : i32
    return %c0_i32, %c0_i32_0, %c0_i32_1 : i32, i32, i32
  }
  func.func @transform_2(%arg0: i32) -> (i32, i32) {
    %c0_i32 = arith.constant 0 : i32
    %c0_i32_0 = arith.constant 0 : i32
    %c0_i32_1 = arith.constant 0 : i32
    return %c0_i32, %c0_i32_0 : i32, i32
  }
  func.func @transform_3(%arg0: i32) -> (i32, i32, i32) {
    %c0_i32 = arith.constant 0 : i32
    %c0_i32_0 = arith.constant 0 : i32
    %c0_i32_1 = arith.constant 0 : i32
    return %arg0, %c0_i32, %c0_i32_0 : i32, i32, i32
  }
  func.func @transform_4(%arg0: i32) -> (i32, i32, i32) {
    %c0_i32 = arith.constant 0 : i32
    %c0_i32_0 = arith.constant 0 : i32
    %c0_i32_1 = arith.constant 0 : i32
    return %arg0, %c0_i32, %c0_i32_0 : i32, i32, i32
  }
}

</mosaic_0001>

<bundles_post_ra>
// kernel: tpu_custom_call.1
= control target key start
LH: loop header
LB: loop body
LE: loop exit
PB: predicated region body
PF: predicated region fallthrough
CT: control target
= control target key end

     0   :  { %10 = vsyncpa [#allocation3], 0  ;;  %s5282_s0 = inlined_call_operand.vmem [shape: f32[2,258,4], index: 0, kind: input, shape index: {}]   ;;  %s5283_s1 = inlined_call_operand.vmem [shape: bf16[9,4,128], index: 1, kind: input, shape index: {}]   ;;  %s5284_s2 = inlined_call_operand.vmem [shape: f32[224,1], index: 2, kind: input, shape index: {}]   ;;  %s5285_s3 = inlined_call_operand.hbm [shape: bf16[2,224,128], index: 3, kind: output, shape index: {0}]   ;;  %s5286_s4 = inlined_call_operand.hbm [shape: f32[2,2,128], index: 4, kind: output, shape index: {1}]  }
   0x1   :  { %12 = vsyncpa [#allocation3 + $0x1], 0 }
   0x2   :  { %13 = vsyncpa [#allocation5], 0 }
   0x3   :  { %15 = vsyncpa [#allocation5 + $0x1], 0  ;;  %s4229_s15 = smov 0   ;;  %s4231_s16 = smov 0  }
   0x4   :  { %s4233_s17 = smov 0   ;;  %s4235_s18 = smov 0  }
   0x5 LB: > { %s4250_s19 = sadd.s32 4294967295, %s4197_s18   ;;  %s3126_s20 = sadd.s32 4294967294, %s4197_s18   ;;  %s4197_s18 = sphi %s4235_s18, %s5313_s18   ;;  %s4193_s17 = sphi %s4233_s17, %s5312_s17   ;;  %s4189_s16 = sphi %s4231_s16, %s5311_s16   ;;  %s4185_s15 = sphi %s4229_s15, %s5310_s15  }
   0x6   : > { %s4254_s21 = sadd.s32 1, %s4197_s18   ;;  %s96_s22 = sadd.s32 1, %s4193_s17 }
   0x7   : > { %s93_s23 = ssub.s32 %s4197_s18, %s4254_s21  ;;  %p106_p0 = scmp.ne.s32.totalorder %s4193_s17, %s4189_s16 }
   0x8   : > { %p94_p1 = scmp.eq.s32.totalorder %s93_s23, 0  ;;  %p107_p2 = scmp.eq.s32.totalorder %s4250_s19, 1 }
   0x9   : > { %p112_p3 = scmp.ne.s32.totalorder %s4189_s16, %s4185_s15  ;;  %p113_p4 = scmp.eq.s32.totalorder %s3126_s20, 1 }
   0xa   : > { %s4265_s24 = scalar_select %p94_p1, %s4193_s17, %s96_s22  }
   0xb   : > { %p4267_p5 = por %p107_p2, %p106_p0  ;;  %p4271_p6 = por %p113_p4, %p112_p3 }
   0xc   : > { %p3129_p7 = scmp.ge.s32.totalorder %s4197_s18, 1  ;;  %p171_p8 = scmp.lt.s32.totalorder %s4197_s18, 3 }
   0xe   : > { %p172_p9 = pnand %p3129_p7, %p171_p8 }
  0x10   : > { %175 = sbr.rel (%p172_p9) target bundleno = 624 (0x270), region = 32 }
  0x17   : > { %vm338_vm0 = vcmask 1041408   ;;  %v4280_v0 = vld [vmem:[%s5283_s1 + $0x8] sm:$0x3]  ;;  %v3132_v1 = vld [vmem:[%s5283_s1 + $0x2] sm:$0x3]  ;;  %p202_p10 = scmp.lt.s32.totalorder %s4250_s19, 1 }
  0x18   : > { %4045 = vmatprep.subr.msk.bf16.mxu0 %vm338_vm0, %v4280_v0  ;;  %4041 = vmatprep.subr.msk.bf16.mxu1 %vm338_vm0, %v3132_v1  ;;  %v4291_v2 = vsel %vm338_vm0, %v4280_v0, 0  ;;  %v340_v3 = vsel %vm338_vm0, %v3132_v1, 0  ;;  %v3206_v4 = vld [vmem:[%s5283_s1 + $0xa] sm:$0x3]  ;;  %v250_v5 = vld [vmem:[%s5283_s1] sm:$0x3] }
  0x19   : > { %3666 = vmatpush3.bf16.msra.mxu0 %v4291_v2  ;;  %3546 = vmatpush3.bf16.msra.mxu1 %v340_v3  ;;  %s203_s7 = scalar_select %p202_p10, %s4250_s19, 1  ;;  %vm295_vm1 = vcmask 31744   ;;  %v1550_v17 = vsel %vm338_vm0, %v3206_v4, 0  ;;  %v530_v19 = vsel %vm338_vm0, %v250_v5, 0  ;;  %v3221_v20 = vld [vmem:[%s5283_s1 + $0xc] sm:$0x3] }
  0x1a   : > { %4047 = vmatprep.subr.msk.bf16.mxu0 %vm338_vm0, %v3206_v4  ;;  %4042 = vmatprep.subr.msk.bf16.mxu1 %vm338_vm0, %v250_v5  ;;  %v4336_v21 = vld [vmem:[%s5283_s1 + $0x4] sm:$0x3]  ;;  %v1812_v52 = vsel %vm338_vm0, %v3221_v20, 0  ;;  %v4413_v53 = vld [vmem:[%s5283_s1 + $0xe] sm:$0x3]  ;;  %s4053_s27 = smul.u32 1792, %s4250_s19 }
  0x1b   : > { %s4052_s10 = smul.u32 264, %s203_s7  ;;  %s4200_s8 = smov [#allocation2]  }
  0x1c   : > { %s5091_s5 = scalar_lea.hbm %s5285_s3, %s4053_s27  ;;  %s4107_s9 = sshll.u32 %s4200_s8, 4  ;;  %s4108_s9 = int_to_ptr.vmem [resolvable:$false] %s4107_s9 }
  0x1d   : > { %s4307_s13 = scalar_lea.vmem %s5282_s0, %s4052_s10  ;;  %s4109_s10 = scalar_lea.vmem %s4108_s9, 3584 }
  0x1e   : > { %v251_v6 = vld [vmem:[%s4307_s13 + $0x1] sm:$0xff]  ;;  %v252_v7 = vld [vmem:[%s4307_s13 + $0x9] sm:$0xff]  ;;  %v1201_v8 = vld [vmem:[%s4307_s13 + $0x11] sm:$0xff] }
  0x1f   : > { %v279_v9 = vpack.c.bf16 %v252_v7, %v251_v6  ;;  %v1202_v10 = vld [vmem:[%s4307_s13 + $0x19] sm:$0xff]  ;;  %v1203_v11 = vld [vmem:[%s4307_s13 + $0x21] sm:$0xff]  ;;  %v1204_v12 = vld [vmem:[%s4307_s13 + $0x29] sm:$0xff] }
  0x20   : > { %v1229_v13 = vpack.c.bf16 %v1202_v10, %v1201_v8  ;;  %v4315_v14 = vpack.c.bf16 %v1204_v12, %v1203_v11  ;;  %v1205_v15 = vld [vmem:[%s4307_s13 + $0x31] sm:$0xff]  ;;  %v1206_v16 = vld [vmem:[%s4307_s13 + $0x39] sm:$0xff]  ;;  %v1207_v22 = vld [vmem:[%s4307_s13 + $0x41] sm:$0xff] }
  0x21   : > { %3547 = vmatprep.mubr.msk.bf16.mxu1 %vm295_vm1, %v279_v9  ;;  %v4321_v18 = vpack.c.bf16 %v1206_v16, %v1205_v15  ;;  %v1208_v23 = vld [vmem:[%s4307_s13 + $0x49] sm:$0xff]  ;;  %v1209_v24 = vld [vmem:[%s4307_s13 + $0x51] sm:$0xff]  ;;  %v1210_v25 = vld [vmem:[%s4307_s13 + $0x59] sm:$0xff] }
  0x22   : > { %3667 = vmatprep.mubr.msk.bf16.mxu0 %vm295_vm1, %v1229_v13  ;;  %3548 = vmatmul.mubr.msk.bf16.vlgmr.msra.gmra.mrb[0].mxu1 %vm295_vm1, %v1229_v13  ;;  %v4347_v26 = vpack.c.bf16 %v1208_v23, %v1207_v22  ;;  %v4349_v27 = vpack.c.bf16 %v1210_v25, %v1209_v24  ;;  %v1211_v28 = vld [vmem:[%s4307_s13 + $0x61] sm:$0xff]  ;;  %v1212_v29 = vld [vmem:[%s4307_s13 + $0x69] sm:$0xff]  ;;  %v1213_v30 = vld [vmem:[%s4307_s13 + $0x71] sm:$0xff] }
  0x23   : > { %3668 = vmatmul.mubr.msk.bf16.vlgmr.msra.gmra.mrb[0].mxu0 %vm295_vm1, %v4315_v14  ;;  %3551 = vmatprep.mubr.msk.bf16.mxu1 %vm295_vm1, %v4315_v14  ;;  %v1214_v31 = vld [vmem:[%s4307_s13 + $0x79] sm:$0xff]  ;;  %v4363_v32 = vpack.c.bf16 %v1212_v29, %v1211_v28  ;;  %v1215_v34 = vld [vmem:[%s4307_s13 + $0x81] sm:$0xff]  ;;  %v1216_v35 = vld [vmem:[%s4307_s13 + $0x89] sm:$0xff] }
  0x24   : > { %3696 = vmatpush3.bf16.msra.mxu0 %v1550_v17  ;;  %3671 = vmatprep.mubr.msk.bf16.mxu0 %vm295_vm1, %v4321_v18  ;;  %v4365_v33 = vpack.c.bf16 %v1214_v31, %v1213_v30  ;;  %v1463_v36 = vld [vmem:[%s4307_s13 + $0x12] sm:$0xff]  ;;  %v1464_v37 = vld [vmem:[%s4307_s13 + $0x1a] sm:$0xff]  ;;  %v4379_v38 = vpack.c.bf16 %v1216_v35, %v1215_v34  ;;  %v1465_v42 = vld [vmem:[%s4307_s13 + $0x22] sm:$0xff]  ;;  %v764_v35 = vsel %vm338_vm0, %v4336_v21, 0 }
  0x25   : > { %3576 = vmatpush3.bf16.msra.mxu1 %v530_v19  ;;  %4048 = vmatprep.subr.msk.bf16.mxu0 %vm338_vm0, %v3221_v20  ;;  %v4381_v39 = vpack.c.bf16 %v1464_v37, %v1463_v36  ;;  %v269_v40 = vld [vmem:[%s4307_s13 + $0x91] sm:$0xff]  ;;  %v270_v41 = vld [vmem:[%s4307_s13 + $0x99] sm:$0xff]  ;;  %v271_v44 = vld [vmem:[%s4307_s13 + $0xa1] sm:$0xff] }
  0x26   : > { %4043 = vmatprep.subr.msk.bf16.mxu1 %vm338_vm0, %v4336_v21  ;;  %v1466_v43 = vld [vmem:[%s4307_s13 + $0x2a] sm:$0xff]  ;;  %v1467_v46 = vld [vmem:[%s4307_s13 + $0x32] sm:$0xff]  ;;  %v1468_v47 = vld [vmem:[%s4307_s13 + $0x3a] sm:$0xff]  ;;  %v4399_v48 = vpack.c.bf16 %v270_v41, %v269_v40 }
  0x27   : > { %v272_v45 = vld [vmem:[%s4307_s13 + $0xa9] sm:$0xff]  ;;  %v4401_v49 = vpack.c.bf16 %v1466_v43, %v1465_v42  ;;  %v4405_v51 = vpack.c.bf16 %v1468_v47, %v1467_v46  ;;  %v273_v54 = vld [vmem:[%s4307_s13 + $0xb1] sm:$0xff]  ;;  %v274_v55 = vld [vmem:[%s4307_s13 + $0xb9] sm:$0xff] }
  0x28   : > { %v4403_v50 = vpack.c.bf16 %v272_v45, %v271_v44  ;;  %v1469_v56 = vld [vmem:[%s4307_s13 + $0x42] sm:$0xff]  ;;  %v1470_v57 = vld [vmem:[%s4307_s13 + $0x4a] sm:$0xff]  ;;  %v1471_v60 = vld [vmem:[%s4307_s13 + $0x52] sm:$0xff]  ;;  %v4431_v62 = vpack.c.bf16 %v274_v55, %v273_v54 }
  0x29   : > { %v275_v58 = vld [vmem:[%s4307_s13 + $0xc1] sm:$0xff]  ;;  %v276_v59 = vld [vmem:[%s4307_s13 + $0xc9] sm:$0xff]  ;;  %v4433_v63 = vpack.c.bf16 %v1470_v57, %v1469_v56  ;;  %v277_v4 = vld [vmem:[%s4307_s13 + $0xd1] sm:$0xff] }
  0x2a   : > { %3552 = vmatmul.mubr.msk.bf16.gmra.mrb[4].mxu1 %vm295_vm1, %v4321_v18  ;;  %v1472_v61 = vld [vmem:[%s4307_s13 + $0x5a] sm:$0xff]  ;;  %v4435_v1 = vpack.c.bf16 %v276_v59, %v275_v58  ;;  %v1473_v6 = vld [vmem:[%s4307_s13 + $0x62] sm:$0xff]  ;;  %v1474_v7 = vld [vmem:[%s4307_s13 + $0x6a] sm:$0xff] }
  0x2b   : > { %3672 = vmatmul.mubr.msk.bf16.gmra.mrb[4].mxu0 %vm295_vm1, %v4347_v26  ;;  %3555 = vmatprep.mubr.msk.bf16.mxu1 %vm295_vm1, %v4347_v26  ;;  %v4437_v3 = vpack.c.bf16 %v1472_v61, %v1471_v60  ;;  %v278_v5 = vld [vmem:[%s4307_s13 + $0xd9] sm:$0xff]  ;;  %v209_v9 = vld [vmem:[%s4307_s13 + $0x8] sm:$0xff]  ;;  %v4457_v13 = vpack.c.bf16 %v1474_v7, %v1473_v6  ;;  %v210_v17 = vld [vmem:[%s4307_s13 + $0x10] sm:$0xff] }
  0x2c   : > { %3675 = vmatprep.mubr.msk.bf16.mxu0 %vm295_vm1, %v4349_v27  ;;  %v208_v8 = vld [vmem:[%s4307_s13] sm:$0xff]  ;;  %v1475_v10 = vld [vmem:[%s4307_s13 + $0x72] sm:$0xff]  ;;  %v4455_v12 = vpack.c.bf16 %v278_v5, %v277_v4  ;;  %v1478_v22 = vld [vmem:[%s4307_s13 + $0x8a] sm:$0xff] }
  0x2d   : > { %v1476_v11 = vld [vmem:[%s4307_s13 + $0x7a] sm:$0xff]  ;;  %v236_v15 = vpack.c.bf16 %v209_v9, %v208_v8  ;;  %v1477_v20 = vld [vmem:[%s4307_s13 + $0x82] sm:$0xff]  ;;  %v1479_v25 = vld [vmem:[%s4307_s13 + $0x92] sm:$0xff] }
  0x2e   : > { %v4459_v16 = vpack.c.bf16 %v1476_v11, %v1475_v10  ;;  %v211_v19 = vld [vmem:[%s4307_s13 + $0x18] sm:$0xff]  ;;  %v212_v23 = vld [vmem:[%s4307_s13 + $0x20] sm:$0xff]  ;;  %v213_v24 = vld [vmem:[%s4307_s13 + $0x28] sm:$0xff]  ;;  %v4478_v30 = vpack.c.bf16 %v1478_v22, %v1477_v20 }
  0x2f   : > { %v1480_v28 = vld [vmem:[%s4307_s13 + $0x9a] sm:$0xff]  ;;  %v4476_v29 = vpack.c.bf16 %v211_v19, %v210_v17  ;;  %v4480_v31 = vpack.c.bf16 %v213_v24, %v212_v23  ;;  %v4491_v36 = vld [vmem:[%s5283_s1 + $0x6] sm:$0x3]  ;;  %v214_v37 = vld [vmem:[%s4307_s13 + $0x30] sm:$0xff] }
  0x30   : > { %v4482_v34 = vpack.c.bf16 %v1480_v28, %v1479_v25  ;;  %v215_v40 = vld [vmem:[%s4307_s13 + $0x38] sm:$0xff]  ;;  %v1481_v41 = vld [vmem:[%s4307_s13 + $0xa2] sm:$0xff]  ;;  %v1482_v21 = vld [vmem:[%s4307_s13 + $0xaa] sm:$0xff] }
  0x31   : > { %v216_v42 = vld [vmem:[%s4307_s13 + $0x40] sm:$0xff]  ;;  %v217_v43 = vld [vmem:[%s4307_s13 + $0x48] sm:$0xff]  ;;  %v1483_v44 = vld [vmem:[%s4307_s13 + $0xb2] sm:$0xff]  ;;  %v4509_v46 = vpack.c.bf16 %v215_v40, %v214_v37  ;;  %v4511_v47 = vpack.c.bf16 %v1482_v21, %v1481_v41  ;;  %v2074_v41 = vsel %vm338_vm0, %v4413_v53, 0 }
  0x32   : > { %3556 = vmatmul.mubr.msk.bf16.gmra.mrb[8].mxu1 %vm295_vm1, %v4349_v27  ;;  %v1484_v45 = vld [vmem:[%s4307_s13 + $0xba] sm:$0xff]  ;;  %v218_v55 = vld [vmem:[%s4307_s13 + $0x50] sm:$0xff]  ;;  %v1485_v57 = vld [vmem:[%s4307_s13 + $0xc2] sm:$0xff] }
  0x33   : > { %3676 = vmatmul.mubr.msk.bf16.gmra.mrb[8].mxu0 %vm295_vm1, %v4363_v32  ;;  %3559 = vmatprep.mubr.msk.bf16.mxu1 %vm295_vm1, %v4363_v32  ;;  %v4515_v54 = vpack.c.bf16 %v1484_v45, %v1483_v44  ;;  %v219_v56 = vld [vmem:[%s4307_s13 + $0x58] sm:$0xff]  ;;  %v1486_v58 = vld [vmem:[%s4307_s13 + $0xca] sm:$0xff]  ;;  %v220_v59 = vld [vmem:[%s4307_s13 + $0x60] sm:$0xff] }
  0x34   : > { %3679 = vmatprep.mubr.msk.bf16.mxu0 %vm295_vm1, %v4365_v33  ;;  %v221_v60 = vld [vmem:[%s4307_s13 + $0x68] sm:$0xff]  ;;  %v1487_v61 = vld [vmem:[%s4307_s13 + $0xd2] sm:$0xff]  ;;  %v1488_v4 = vld [vmem:[%s4307_s13 + $0xda] sm:$0xff]  ;;  %v4533_v5 = vpack.c.bf16 %v219_v56, %v218_v55  ;;  %v4535_v6 = vpack.c.bf16 %v1486_v58, %v1485_v57 }
  0x35   : > { %v4537_v7 = vpack.c.bf16 %v221_v60, %v220_v59  ;;  %v4539_v8 = vpack.c.bf16 %v1488_v4, %v1487_v61  ;;  %v222_v9 = vld [vmem:[%s4307_s13 + $0x70] sm:$0xff]  ;;  %v223_v10 = vld [vmem:[%s4307_s13 + $0x78] sm:$0xff]  ;;  %v1489_v11 = vld [vmem:[%s4307_s13 + $0xe2] sm:$0xff]  ;;  %v4199_v60 = vmov 0  }
  0x36   : > { %v224_v17 = vld [vmem:[%s4307_s13 + $0x80] sm:$0xff]  ;;  %v225_v19 = vld [vmem:[%s4307_s13 + $0x88] sm:$0xff]  ;;  %v4555_v20 = vpack.c.bf16 %v223_v10, %v222_v9  ;;  %v226_v24 = vld [vmem:[%s4307_s13 + $0x90] sm:$0xff]  ;;  %4101 = vset.pattern.permute.xlu0 %v4199_v60  ;;  %4102 = vset.pattern.permute.xlu1 %v4199_v60 }
  0x37   : > { %v4559_v23 = vpack.c.bf16 %v225_v19, %v224_v17  ;;  %v227_v25 = vld [vmem:[%s4307_s13 + $0x98] sm:$0xff]  ;;  %v228_v28 = vld [vmem:[%s4307_s13 + $0xa0] sm:$0xff]  ;;  %v4584_v21 = vld [vmem:[%s5283_s1 + $0x10] sm:$0x3] }
  0x38   : > { %v4573_v37 = vpack.c.bf16 %v227_v25, %v226_v24  ;;  %v233_v44 = vld [vmem:[%s4307_s13 + $0xc8] sm:$0xff]  ;;  %v234_v56 = vld [vmem:[%s4307_s13 + $0xd0] sm:$0xff]  ;;  %v235_v57 = vld [vmem:[%s4307_s13 + $0xd8] sm:$0xff] }
  0x39   : > { %v677_v58 = vld [vmem:[%s4307_s13 + $0x2] sm:$0xff]  ;;  %v678_v59 = vld [vmem:[%s4307_s13 + $0xa] sm:$0xff]  ;;  %v4614_v61 = vpack.c.bf16 %v235_v57, %v234_v56  ;;  %v2654_v17 = vld [vmem:[%s5284_s2 + $0x18] sm:$0xff] }
  0x3a   : > { %3560 = vmatmul.mubr.msk.bf16.gmra.mrb[12].mxu1 %vm295_vm1, %v4365_v33  ;;  %v705_v4 = vpack.c.bf16 %v678_v59, %v677_v58  ;;  %v2651_v9 = vld [vmem:[%s5284_s2] sm:$0xff]  ;;  %v2653_v10 = vld [vmem:[%s5284_s2 + $0x10] sm:$0xff]  ;;  %v1752_v56 = vld [vmem:[%s4307_s13 + $0xf8] sm:$0xff] }
  0x3b   : > { %3680 = vmatmul.mubr.msk.bf16.gmra.mrb[12].mxu0 %vm295_vm1, %v4379_v38  ;;  %3563 = vmatprep.mubr.msk.bf16.mxu1 %vm295_vm1, %v4379_v38  ;;  %v2655_v19 = vld [vmem:[%s5284_s2 + $0x20] sm:$0xff]  ;;  %v2664_v57 = vld [vmem:[%s5284_s2 + $0x68] sm:$0xff]  ;;  %v2665_v59 = vld [vmem:[%s5284_s2 + $0x70] sm:$0xff] }
  0x3c   : > { %3697 = vmatprep.mubr.msk.bf16.mxu0 %vm295_vm1, %v4381_v39  ;;  %2681 = vperm.xlu0 %4101, %v2651_v9   ;;  %v2659_v24 = vld [vmem:[%s5284_s2 + $0x40] sm:$0xff]  ;;  %v2666_v60 = vld [vmem:[%s5284_s2 + $0x78] sm:$0xff]  ;;  %v2668_v9 = vld [vmem:[%s5284_s2 + $0x88] sm:$0xff] }
  0x3d   : > { %2691 = vperm.xlu1 %4102, %v2653_v10   ;;  %v1749_v25 = vld [vmem:[%s4307_s13 + $0xe0] sm:$0xff]  ;;  %v2669_v10 = vld [vmem:[%s5284_s2 + $0x90] sm:$0xff] }
  0x41   : > { %2696 = vperm.xlu1 %4102, %v2654_v17   ;;  %v2674_v17 = vld [vmem:[%s5284_s2 + $0xb8] sm:$0xff] }
  0x42   : > { %3564 = vmatmul.mubr.msk.bf16.gmra.mrb[16].mxu1 %vm295_vm1, %v4399_v48 }
  0x43   : > { %3698 = vmatmul.mubr.msk.bf16.vlgmr.msra.gmra.mrb[0].mxu0 %vm295_vm1, %v4401_v49  ;;  %3567 = vmatprep.mubr.msk.bf16.mxu1 %vm295_vm1, %v4403_v50 }
  0x44   : > { %3726 = vmatpush3.bf16.msra.mxu0 %v1812_v52  ;;  %3701 = vmatprep.mubr.msk.bf16.mxu0 %vm295_vm1, %v4405_v51  ;;  %v4513_v52 = vpack.c.bf16 %v217_v43, %v216_v42  ;;  %v230_v42 = vld [vmem:[%s4307_s13 + $0xb0] sm:$0xff]  ;;  %v232_v43 = vld [vmem:[%s4307_s13 + $0xc0] sm:$0xff] }
  0x45   : > { %4049 = vmatprep.subr.msk.bf16.mxu0 %vm338_vm0, %v4413_v53  ;;  %v231_v53 = vld [vmem:[%s4307_s13 + $0xb8] sm:$0xff]  ;;  %v4600_v55 = vpack.c.bf16 %v233_v44, %v232_v43  ;;  %v2663_v43 = vld [vmem:[%s5284_s2 + $0x60] sm:$0xff]  ;;  %v1751_v44 = vld [vmem:[%s4307_s13 + $0xf0] sm:$0xff] }
  0x46   : > { %v4598_v45 = vpack.c.bf16 %v231_v53, %v230_v42  ;;  %v2662_v53 = vld [vmem:[%s5284_s2 + $0x58] sm:$0xff]  ;;  %v1766_v58 = vpack.c.bf16 %v1752_v56, %v1751_v44 }
  0x4a   : > { %3568 = vmatmul.mubr.msk.bf16.gmra.mrb[20].mxu1 %vm295_vm1, %v4431_v62 }
  0x4b   : > { %3702 = vmatmul.mubr.msk.bf16.gmra.mrb[4].mxu0 %vm295_vm1, %v4433_v63  ;;  %3571 = vmatprep.mubr.msk.bf16.mxu1 %vm295_vm1, %v4435_v1 }
  0x4c   : > { %3705 = vmatprep.mubr.msk.bf16.mxu0 %vm295_vm1, %v4437_v3 }
  0x52   : > { %3572 = vmatmul.mubr.msk.bf16.gmra.mrb[24].mxu1 %vm295_vm1, %v4455_v12 }
  0x53   : > { %3706 = vmatmul.mubr.msk.bf16.gmra.mrb[8].mxu0 %vm295_vm1, %v4457_v13  ;;  %3577 = vmatprep.mubr.msk.bf16.mxu1 %vm295_vm1, %v236_v15  ;;  %v1490_v15 = vld [vmem:[%s4307_s13 + $0xea] sm:$0xff] }
  0x54   : > { %3709 = vmatprep.mubr.msk.bf16.mxu0 %vm295_vm1, %v4459_v16  ;;  %v4557_v22 = vpack.c.bf16 %v1490_v15, %v1489_v11  ;;  %v2652_v11 = vld [vmem:[%s5284_s2 + $0x8] sm:$0xff]  ;;  %v1026_v15 = vsel %vm338_vm0, %v4491_v36, 0 }
  0x55   : > { %2686 = vperm.xlu0 %4101, %v2652_v11   ;;  %v2336_v11 = vsel %vm338_vm0, %v4584_v21, 0 }
  0x59   : > { %2701 = vperm.xlu0 %4101, %v2655_v19   ;;  %v2676_v19 = vld [vmem:[%s5284_s2 + $0xc8] sm:$0xff] }
  0x5a   : > { %3578 = vmatmul.mubr.msk.bf16.vlgmr.msra.gmra.mrb[0].mxu1 %vm295_vm1, %v4476_v29 }
  0x5b   : > { %3710 = vmatmul.mubr.msk.bf16.gmra.mrb[12].mxu0 %vm295_vm1, %v4478_v30  ;;  %3581 = vmatprep.mubr.msk.bf16.mxu1 %vm295_vm1, %v4480_v31 }
  0x5c   : > { %3713 = vmatprep.mubr.msk.bf16.mxu0 %vm295_vm1, %v4482_v34  ;;  %3606 = vmatpush3.bf16.msra.mxu1 %v764_v35  ;;  %v229_v35 = vld [vmem:[%s4307_s13 + $0xa8] sm:$0xff] }
  0x5d   : > { %4044 = vmatprep.subr.msk.bf16.mxu1 %vm338_vm0, %v4491_v36  ;;  %v4575_v40 = vpack.c.bf16 %v229_v35, %v228_v28  ;;  %v2657_v36 = vld [vmem:[%s5284_s2 + $0x30] sm:$0xff]  ;;  %v1750_v28 = vld [vmem:[%s4307_s13 + $0xe8] sm:$0xff] }
  0x5e   : > { %2711 = vperm.xlu0 %4101, %v2657_v36   ;;  %v2660_v35 = vld [vmem:[%s5284_s2 + $0x48] sm:$0xff]  ;;  %v4678_v42 = vpack.c.bf16 %v1750_v28, %v1749_v25 }
  0x62   : > { %3582 = vmatmul.mubr.msk.bf16.gmra.mrb[4].mxu1 %vm295_vm1, %v4509_v46  ;;  %2721 = vperm.xlu0 %4101, %v2659_v24  }
  0x63   : > { %3714 = vmatmul.mubr.msk.bf16.gmra.mrb[16].mxu0 %vm295_vm1, %v4511_v47  ;;  %3585 = vmatprep.mubr.msk.bf16.mxu1 %vm295_vm1, %v4513_v52 }
  0x64   : > { %3717 = vmatprep.mubr.msk.bf16.mxu0 %vm295_vm1, %v4515_v54 }
  0x6a   : > { %3586 = vmatmul.mubr.msk.bf16.gmra.mrb[8].mxu1 %vm295_vm1, %v4533_v5 }
  0x6b   : > { %3718 = vmatmul.mubr.msk.bf16.gmra.mrb[20].mxu0 %vm295_vm1, %v4535_v6  ;;  %3589 = vmatprep.mubr.msk.bf16.mxu1 %vm295_vm1, %v4537_v7 }
  0x6c   : > { %3721 = vmatprep.mubr.msk.bf16.mxu0 %vm295_vm1, %v4539_v8 }
  0x72   : > { %3590 = vmatmul.mubr.msk.bf16.gmra.mrb[12].mxu1 %vm295_vm1, %v4555_v20 }
  0x73   : > { %3722 = vmatmul.mubr.msk.bf16.gmra.mrb[24].mxu0 %vm295_vm1, %v4557_v22  ;;  %3593 = vmatprep.mubr.msk.bf16.mxu1 %vm295_vm1, %v4559_v23 }
  0x74   : > { %3727 = vmatprep.mubr.msk.bf16.mxu0 %vm295_vm1, %v4480_v31 }
  0x7a   : > { %3594 = vmatmul.mubr.msk.bf16.gmra.mrb[16].mxu1 %vm295_vm1, %v4573_v37 }
  0x7b   : > { %3728 = vmatmul.mubr.msk.bf16.vlgmr.msra.gmra.mrb[0].mxu0 %vm295_vm1, %v4509_v46  ;;  %3597 = vmatprep.mubr.msk.bf16.mxu1 %vm295_vm1, %v4575_v40 }
  0x7c   : > { %3756 = vmatpush3.bf16.msra.mxu0 %v2074_v41  ;;  %3731 = vmatprep.mubr.msk.bf16.mxu0 %vm295_vm1, %v4513_v52  ;;  %v2661_v41 = vld [vmem:[%s5284_s2 + $0x50] sm:$0xff] }
  0x7d   : > { %4050 = vmatprep.subr.msk.bf16.mxu0 %vm338_vm0, %v4584_v21  ;;  %2731 = vperm.xlu0 %4101, %v2661_v41   ;;  %v2672_v21 = vld [vmem:[%s5284_s2 + $0xa8] sm:$0xff] }
  0x81   : > { %2741 = vperm.xlu0 %4101, %v2663_v43  }
  0x82   : > { %3598 = vmatmul.mubr.msk.bf16.gmra.mrb[20].mxu1 %vm295_vm1, %v4598_v45 }
  0x83   : > { %3732 = vmatmul.mubr.msk.bf16.gmra.mrb[4].mxu0 %vm295_vm1, %v4533_v5  ;;  %3601 = vmatprep.mubr.msk.bf16.mxu1 %vm295_vm1, %v4600_v55 }
  0x84   : > { %3735 = vmatprep.mubr.msk.bf16.mxu0 %vm295_vm1, %v4537_v7 }
  0x85   : > { %2751 = vperm.xlu0 %4101, %v2665_v59  }
  0x8a   : > { %3602 = vmatmul.mubr.msk.bf16.gmra.mrb[24].mxu1 %vm295_vm1, %v4614_v61 }
  0x8b   : > { %3736 = vmatmul.mubr.msk.bf16.gmra.mrb[8].mxu0 %vm295_vm1, %v4555_v20  ;;  %3607 = vmatprep.mubr.msk.bf16.mxu1 %vm295_vm1, %v705_v4  ;;  %v2667_v4 = vld [vmem:[%s5284_s2 + $0x80] sm:$0xff] }
  0x8c   : > { %3739 = vmatprep.mubr.msk.bf16.mxu0 %vm295_vm1, %v4559_v23  ;;  %2761 = vperm.xlu0 %4101, %v2667_v4  }
  0x90   : > { %2771 = vperm.xlu0 %4101, %v2669_v10  }
  0x92   : > { %3608 = vmatmul.mubr.msk.bf16.vlgmr.msra.gmra.mrb[0].mxu1 %vm295_vm1, %v4381_v39  ;;  %v2656_v39 = vld [vmem:[%s5284_s2 + $0x28] sm:$0xff] }
  0x93   : > { %3740 = vmatmul.mubr.msk.bf16.gmra.mrb[12].mxu0 %vm295_vm1, %v4573_v37  ;;  %3611 = vmatprep.mubr.msk.bf16.mxu1 %vm295_vm1, %v4401_v49 }
  0x94   : > { %3743 = vmatprep.mubr.msk.bf16.mxu0 %vm295_vm1, %v4575_v40  ;;  %3636 = vmatpush3.bf16.msra.mxu1 %v1026_v15  ;;  %v2671_v15 = vld [vmem:[%s5284_s2 + $0xa0] sm:$0xff] }
  0x95   : > { %4046 = vmatprep.subr.msk.bf16.mxu1 %vm338_vm0, %v4280_v0  ;;  %2706 = vperm.xlu1 %4102, %v2656_v39   ;;  %v2658_v0 = vld [vmem:[%s5284_s2 + $0x38] sm:$0xff] }
  0x96   : > { %2781 = vperm.xlu0 %4101, %v2671_v15  }
  0x99   : > { %2716 = vperm.xlu1 %4102, %v2658_v0  }
  0x9a   : > { %3612 = vmatmul.mubr.msk.bf16.gmra.mrb[4].mxu1 %vm295_vm1, %v4405_v51 }
  0x9b   : > { %3744 = vmatmul.mubr.msk.bf16.gmra.mrb[16].mxu0 %vm295_vm1, %v4598_v45  ;;  %3615 = vmatprep.mubr.msk.bf16.mxu1 %vm295_vm1, %v4433_v63 }
  0x9c   : > { %3747 = vmatprep.mubr.msk.bf16.mxu0 %vm295_vm1, %v4600_v55 }
  0x9d   : > { %2726 = vperm.xlu1 %4102, %v2660_v35  }
  0xa1   : > { %2736 = vperm.xlu1 %4102, %v2662_v53  }
  0xa2   : > { %3616 = vmatmul.mubr.msk.bf16.gmra.mrb[8].mxu1 %vm295_vm1, %v4437_v3 }
  0xa3   : > { %3748 = vmatmul.mubr.msk.bf16.gmra.mrb[20].mxu0 %vm295_vm1, %v4614_v61  ;;  %3619 = vmatprep.mubr.msk.bf16.mxu1 %vm295_vm1, %v4457_v13 }
  0xa4   : > { %3751 = vmatprep.mubr.msk.bf16.mxu0 %vm295_vm1, %v4678_v42 }
  0xa5   : > { %2746 = vperm.xlu1 %4102, %v2664_v57  }
  0xa9   : > { %2756 = vperm.xlu1 %4102, %v2666_v60  }
  0xaa   : > { %3620 = vmatmul.mubr.msk.bf16.gmra.mrb[12].mxu1 %vm295_vm1, %v4459_v16 }
  0xab   : > { %3752 = vmatmul.mubr.msk.bf16.gmra.mrb[24].mxu0 %vm295_vm1, %v1766_v58  ;;  %3623 = vmatprep.mubr.msk.bf16.mxu1 %vm295_vm1, %v4478_v30 }
  0xac   : > { %3757 = vmatprep.mubr.msk.bf16.mxu0 %vm295_vm1, %v4315_v14  ;;  %v2670_v14 = vld [vmem:[%s5284_s2 + $0x98] sm:$0xff] }
  0xad   : > { %2766 = vperm.xlu1 %4102, %v2668_v9  }
  0xb1   : > { %2776 = vperm.xlu1 %4102, %v2670_v14  }
  0xb2   : > { %3624 = vmatmul.mubr.msk.bf16.gmra.mrb[16].mxu1 %vm295_vm1, %v4482_v34 }
  0xb3   : > { %3758 = vmatmul.mubr.msk.bf16.vlgmr.msra.gmra.mrb[0].mxu0 %vm295_vm1, %v4321_v18  ;;  %3627 = vmatprep.mubr.msk.bf16.mxu1 %vm295_vm1, %v4511_v47  ;;  %v2673_v18 = vld [vmem:[%s5284_s2 + $0xb0] sm:$0xff] }
  0xb4   : > { %3786 = vmatpush3.bf16.msra.mxu0 %v2336_v11  ;;  %3761 = vmatprep.mubr.msk.bf16.mxu0 %vm295_vm1, %v4347_v26  ;;  %v2675_v26 = vld [vmem:[%s5284_s2 + $0xc0] sm:$0xff] }
  0xb5   : > { %2786 = vperm.xlu1 %4102, %v2672_v21   ;;  %2791 = vperm.xlu0 %4101, %v2673_v18  }
  0xb9   : > { %2796 = vperm.xlu1 %4102, %v2674_v17   ;;  %2801 = vperm.xlu0 %4101, %v2675_v26  }
  0xba   : > { %3628 = vmatmul.mubr.msk.bf16.gmra.mrb[20].mxu1 %vm295_vm1, %v4515_v54 }
  0xbb   : > { %3762 = vmatmul.mubr.msk.bf16.gmra.mrb[4].mxu0 %vm295_vm1, %v4349_v27  ;;  %3631 = vmatprep.mubr.msk.bf16.mxu1 %vm295_vm1, %v4535_v6  ;;  %v2677_v27 = vld [vmem:[%s5284_s2 + $0xd0] sm:$0xff] }
  0xbc   : > { %3765 = vmatprep.mubr.msk.bf16.mxu0 %vm295_vm1, %v4363_v32  ;;  %v2678_v32 = vld [vmem:[%s5284_s2 + $0xd8] sm:$0xff] }
  0xbd   : > { %2806 = vperm.xlu1 %4102, %v2676_v19   ;;  %2811 = vperm.xlu0 %4101, %v2677_v27  }
  0xc1   : > { %2816 = vperm.xlu1 %4102, %v2678_v32  }
  0xc2   : > { %3632 = vmatmul.mubr.msk.bf16.gmra.mrb[24].mxu1 %vm295_vm1, %v4539_v8 }
  0xc3   : > { %3766 = vmatmul.mubr.msk.bf16.gmra.mrb[8].mxu0 %vm295_vm1, %v4365_v33  ;;  %3637 = vmatprep.mubr.msk.bf16.mxu1 %vm295_vm1, %v4476_v29  ;;  %v2011_v33 = vld [vmem:[%s4307_s13 + $0xe1] sm:$0xff] }
  0xc4   : > { %3769 = vmatprep.mubr.msk.bf16.mxu0 %vm295_vm1, %v4379_v38  ;;  %v2012_v38 = vld [vmem:[%s4307_s13 + $0xe9] sm:$0xff] }
  0xc5   : > { %v2027_v29 = vpack.c.bf16 %v2012_v38, %v2011_v33 }
  0xca   : > { %3638 = vmatmul.mubr.msk.bf16.vlgmr.msra.gmra.mrb[0].mxu1 %vm295_vm1, %v4480_v31  ;;  %v2014_v31 = vld [vmem:[%s4307_s13 + $0xf9] sm:$0xff] }
  0xcb   : > { %3770 = vmatmul.mubr.msk.bf16.gmra.mrb[12].mxu0 %vm295_vm1, %v4399_v48  ;;  %3641 = vmatprep.mubr.msk.bf16.mxu1 %vm295_vm1, %v4509_v46 }
  0xcc   : > { %3773 = vmatprep.mubr.msk.bf16.mxu0 %vm295_vm1, %v4403_v50  ;;  %3816 = vmatpush3.bf16.msra.mxu1 %v4291_v2  ;;  %v2013_v2 = vld [vmem:[%s4307_s13 + $0xf1] sm:$0xff] }
  0xcd   : > { %v2028_v46 = vpack.c.bf16 %v2014_v31, %v2013_v2 }
  0xd2   : > { %3642 = vmatmul.mubr.msk.bf16.gmra.mrb[4].mxu1 %vm295_vm1, %v4513_v52 }
  0xd3   : > { %3774 = vmatmul.mubr.msk.bf16.gmra.mrb[16].mxu0 %vm295_vm1, %v4431_v62  ;;  %3645 = vmatprep.mubr.msk.bf16.mxu1 %vm295_vm1, %v4533_v5 }
  0xd4   : > { %3777 = vmatprep.mubr.msk.bf16.mxu0 %vm295_vm1, %v4435_v1 }
  0xda   : > { %3646 = vmatmul.mubr.msk.bf16.gmra.mrb[8].mxu1 %vm295_vm1, %v4537_v7 }
  0xdb   : > { %3778 = vmatmul.mubr.msk.bf16.gmra.mrb[20].mxu0 %vm295_vm1, %v4455_v12  ;;  %3649 = vmatprep.mubr.msk.bf16.mxu1 %vm295_vm1, %v4555_v20 }
  0xdc   : > { %3781 = vmatprep.mubr.msk.bf16.mxu0 %vm295_vm1, %v2027_v29 }
  0xe2   : > { %3650 = vmatmul.mubr.msk.bf16.gmra.mrb[12].mxu1 %vm295_vm1, %v4559_v23 }
  0xe3   : > { %3782 = vmatmul.mubr.msk.bf16.gmra.mrb[24].mxu0 %vm295_vm1, %v2028_v46  ;;  %3653 = vmatprep.mubr.msk.bf16.mxu1 %vm295_vm1, %v4573_v37 }
  0xe4   : > { %3787 = vmatprep.mubr.msk.bf16.mxu0 %vm295_vm1, %v4401_v49  ;;  %v2276_v49 = vld [vmem:[%s4307_s13 + $0xfa] sm:$0xff] }
  0xea   : > { %3654 = vmatmul.mubr.msk.bf16.gmra.mrb[16].mxu1 %vm295_vm1, %v4575_v40 }
  0xeb   : > { %3788 = vmatmul.mubr.msk.bf16.vlgmr.msra.gmra.mrb[0].mxu0 %vm295_vm1, %v4405_v51  ;;  %3657 = vmatprep.mubr.msk.bf16.mxu1 %vm295_vm1, %v4598_v45 }
  0xec   : > { %3791 = vmatprep.mubr.msk.bf16.mxu0 %vm295_vm1, %v4433_v63 }
  0xf2   : > { %3658 = vmatmul.mubr.msk.bf16.gmra.mrb[20].mxu1 %vm295_vm1, %v4600_v55 }
  0xf3   : > { %3792 = vmatmul.mubr.msk.bf16.gmra.mrb[4].mxu0 %vm295_vm1, %v4437_v3  ;;  %3661 = vmatprep.mubr.msk.bf16.mxu1 %vm295_vm1, %v4614_v61  ;;  %v4857_v3 = vpop.permute.xlu0 %2681 }
  0xf4   : > { %3795 = vmatprep.mubr.msk.bf16.mxu0 %vm295_vm1, %v4457_v13 }
  0xfa   : > { %3662 = vmatmul.mubr.msk.bf16.gmra.mrb[24].mxu1 %vm295_vm1, %v4678_v42 }
  0xfb   : > { %3796 = vmatmul.mubr.msk.bf16.gmra.mrb[8].mxu0 %vm295_vm1, %v4459_v16  ;;  %3683 = vmatprep.mubr.msk.bf16.mxu1 %vm295_vm1, %v4399_v48  ;;  %v2275_v48 = vld [vmem:[%s4307_s13 + $0xf2] sm:$0xff]  ;;  %s4888_s13 = sand.u32 1, %s4189_s16  }
  0xfc   : > { %3799 = vmatprep.mubr.msk.bf16.mxu0 %vm295_vm1, %v4478_v30  ;;  %s4051_s22 = smul.u32 112, %s4888_s13  ;;  %s3001_s6 = scalar_lea.sflag [#allocation3], %s4888_s13 }
  0xfe   : > { %s4915_s23 = scalar_lea.vmem [#allocation2], %s4051_s22 }
  0xff   : > { %s3019_s28 = sshll.u32 %s4915_s23, 4  ;;  %s5082_s28 = int_to_ptr.vmem [resolvable:$true] %s3019_s28 }
 0x100   : > { %s4103_s7 = scalar_lea.vmem %s5082_s28, 1792  ;;  %p4110_p0 = scmp.lt.s32.totalorder %s5082_s28, %s4108_s9 }
 0x101   : > { %p4104_p11 = scmp.ne.s32.totalorder %s5082_s28, %s4103_s7  ;;  %p4111_p1 = scmp.lt.s32.totalorder %s4109_s10, %s4103_s7 }
 0x102   : > { %3684 = vmatmul.mubr.msk.bf16.vlgmr.msra.gmra.mrb[16].mxu1 %vm295_vm1, %v4403_v50  ;;  %v2290_v50 = vpack.c.bf16 %v2276_v49, %v2275_v48 }
 0x103   : > { %3800 = vmatmul.mubr.msk.bf16.gmra.mrb[12].mxu0 %vm295_vm1, %v4482_v34  ;;  %3687 = vmatprep.mubr.msk.bf16.mxu1 %vm295_vm1, %v4431_v62  ;;  %p4105_p12 = pnand %p4104_p11, %p4267_p5  ;;  %p4112_p2 = por %p4111_p1, %p4110_p0 }
 0x104   : > { %3803 = vmatprep.mubr.msk.bf16.mxu0 %vm295_vm1, %v4511_v47  ;;  %v4861_v47 = vpop.permute.xlu0 %2686 }
 0x105   : > { %p4106_p13 = pneg %p4105_p12 }
 0x107   : > { %p4113_p3 = pnand %p4112_p2, %p4106_p13 }
 0x108   : > { %v4869_v7 = vpop.permute.xlu0 %2701 }
 0x10a   : > { %3688 = vmatmul.mubr.msk.bf16.gmra.mrb[20].mxu1 %vm295_vm1, %v4435_v1 }
 0x10b   : > { %3804 = vmatmul.mubr.msk.bf16.gmra.mrb[16].mxu0 %vm295_vm1, %v4515_v54  ;;  %3691 = vmatprep.mubr.msk.bf16.mxu1 %vm295_vm1, %v4455_v12  ;;  %v4859_v12 = vpop.permute.xlu1 %2691 }
 0x10c   : > { %3807 = vmatprep.mubr.msk.bf16.mxu0 %vm295_vm1, %v4535_v6  ;;  %v4877_v23 = vpop.permute.xlu0 %2711 }
 0x10f   : > { %v4863_v52 = vpop.permute.xlu1 %2696 }
 0x110   : > { %v4890_v61 = vpop.permute.xlu0 %2721 }
 0x112   : > { %3692 = vmatmul.mubr.msk.bf16.gmra.mrb[24].mxu1 %vm295_vm1, %v2027_v29 }
 0x113   : > { %3808 = vmatmul.mubr.msk.bf16.gmra.mrb[20].mxu0 %vm295_vm1, %v4539_v8 }
 0x114   : > { %3811 = vmatprep.mubr.msk.bf16.mxu0 %vm295_vm1, %v4557_v22  ;;  %v4873_v20 = vpop.permute.xlu1 %2706  ;;  %v4901_v42 = vpop.permute.xlu0 %2731 }
 0x118   : > { %v4881_v40 = vpop.permute.xlu1 %2716  ;;  %v4923_v11 = vpop.permute.xlu0 %2741 }
 0x11b   : > { %3812 = vmatmul.mubr.msk.bf16.gmra.mrb[24].mxu0 %vm295_vm1, %v2290_v50 }
 0x11c   : > { %v4892_v39 = vpop.permute.xlu1 %2726  ;;  %v4944_v46 = vpop.permute.xlu0 %2751 }
 0x120   : > { %v4905_v43 = vpop.permute.xlu1 %2736 }
 0x124   : > { %v4929_v17 = vpop.permute.xlu1 %2746 }
 0x19d   : > { %v3639_v51 = vpop.f32.mrb[0].mxu1 }
 0x19e   : > { %v1062_v62 = vpop.f32.mrb[1].mxu1 }
 0x19f   : > { %v3640_v63 = vpop.f32.mrb[2].mxu1 }
 0x1a0   : > { %v1065_v1 = vpop.f32.mrb[3].mxu1 }
 0x1a5   : > { %v3643_v13 = vpop.f32.mrb[4].mxu1 }
 0x1a6   : > { %v1078_v16 = vpop.f32.mrb[5].mxu1 }
 0x1a7   : > { %v3644_v30 = vpop.f32.mrb[6].mxu1 }
 0x1a8   : > { %v1081_v34 = vpop.f32.mrb[7].mxu1 }
 0x1ad   : > { %v3647_v54 = vpop.f32.mrb[8].mxu1 }
 0x1ae   : > { %v4865_v5 = vpop.f32.mrb[9].mxu1 }
 0x1af   : > { %v4867_v6 = vpop.f32.mrb[10].mxu1 }
 0x1b0   : > { %v4871_v8 = vpop.f32.mrb[11].mxu1 }
 0x1b5   : > { %v4875_v22 = vpop.f32.mrb[12].mxu1 }
 0x1b6   : > { %v4879_v37 = vpop.f32.mrb[13].mxu1 }
 0x1b7   : > { %v4883_v45 = vpop.f32.mrb[14].mxu1 }
 0x1b8   : > { %v4885_v55 = vpop.f32.mrb[15].mxu1 }
 0x1be   : > { %v3789_v36 = vpop.f32.mrb[0].mxu0 }
 0x1bf   : > { %v4895_v0 = vadd.f32 %v3789_v36, %v3639_v51  ;;  %v2372_v24 = vpop.f32.mrb[1].mxu0  ;;  %v4949_v51 = vpop.permute.xlu1 %2756 }
 0x1c0   : > { %v4897_v25 = vadd.f32 %v2372_v24, %v1062_v62  ;;  %v3790_v28 = vpop.f32.mrb[2].mxu0 }
 0x1c1   : > { %v4899_v35 = vadd.f32 %v3790_v28, %v3640_v63  ;;  %v2375_v41 = vpop.f32.mrb[3].mxu0  ;;  %v2821_v59 = vmul.f32 %v4895_v0, %v4859_v12 }
 0x1c2   : > { %v4903_v53 = vadd.f32 %v2375_v41, %v1065_v1  ;;  %v2819_v56 = vmul.f32 %v4897_v25, %v4857_v3 }
 0x1c3   : > { %v3335_v44 = vpack.c.bf16 %v4899_v35, %v4895_v0  ;;  %v2822_v14 = vmul.f32 %v4899_v35, %v4863_v52 }
 0x1c4   : > { %v3330_v57 = vpack.c.bf16 %v4903_v53, %v4897_v25  ;;  %v2820_v58 = vmul.f32 %v4903_v53, %v4861_v47 }
 0x1c5   : > { %3397 = vst [vmem:[%s4915_s23 + $0x8] sm:$0xff] %v3335_v44   ;;  %v4968_v44 = vpop.permute.xlu0 %2761 }
 0x1c6   : > { %3331 = vst [vmem:[%s4915_s23] sm:$0xff] %v3330_v57   ;;  %v2847_v60 = vadd.f32 %v2820_v58, %v2819_v56  ;;  %v3793_v4 = vpop.f32.mrb[4].mxu0  ;;  %v4974_v57 = vpop.permute.xlu1 %2766 }
 0x1c7   : > { %v4921_v9 = vadd.f32 %v3793_v4, %v3643_v13  ;;  %v2388_v10 = vpop.f32.mrb[5].mxu0 }
 0x1c8   : > { %v2848_v15 = vadd.f32 %v2847_v60, %v2821_v59  ;;  %v4927_v21 = vadd.f32 %v2388_v10, %v1078_v16  ;;  %v3794_v18 = vpop.f32.mrb[6].mxu0 }
 0x1c9   : > { %v4931_v26 = vadd.f32 %v3794_v18, %v3644_v30  ;;  %v2391_v19 = vpop.f32.mrb[7].mxu0  ;;  %v2825_v48 = vmul.f32 %v4921_v9, %v4877_v23 }
 0x1ca   : > { %v2823_v27 = vmul.f32 %v4927_v21, %v4869_v7  ;;  %v2849_v32 = vadd.f32 %v2848_v15, %v2822_v14  ;;  %v4935_v33 = vadd.f32 %v2391_v19, %v1081_v34 }
 0x1cb   : > { %v3345_v38 = vpack.c.bf16 %v4931_v26, %v4921_v9  ;;  %v2826_v1 = vmul.f32 %v4931_v26, %v4881_v40 }
 0x1cc   : > { %v2850_v29 = vadd.f32 %v2849_v32, %v2823_v27  ;;  %v3340_v2 = vpack.c.bf16 %v4935_v33, %v4927_v21  ;;  %v2824_v31 = vmul.f32 %v4935_v33, %v4873_v20 }
 0x1cd   : > { %3399 = vst [vmem:[%s4915_s23 + $0x18] sm:$0xff] %v3345_v38  }
 0x1ce   : > { %3398 = vst [vmem:[%s4915_s23 + $0x10] sm:$0xff] %v3340_v2   ;;  %v2851_v49 = vadd.f32 %v2850_v29, %v2824_v31  ;;  %v3797_v50 = vpop.f32.mrb[8].mxu0 }
 0x1cf   : > { %v4951_v62 = vadd.f32 %v3797_v50, %v3647_v54  ;;  %v2404_v63 = vpop.f32.mrb[9].mxu0  ;;  %v4998_v50 = vpop.permute.xlu0 %2771 }
 0x1d0   : > { %v2852_v13 = vadd.f32 %v2851_v49, %v2825_v48  ;;  %v4956_v16 = vadd.f32 %v2404_v63, %v4865_v5  ;;  %v3798_v30 = vpop.f32.mrb[10].mxu0 }
 0x1d1   : > { %v4959_v34 = vadd.f32 %v3798_v30, %v4867_v6  ;;  %v2407_v36 = vpop.f32.mrb[11].mxu0 }
 0x1d2   : > { %v2827_v24 = vmul.f32 %v4956_v16, %v4890_v61  ;;  %v2853_v54 = vadd.f32 %v2852_v13, %v2826_v1  ;;  %v4964_v28 = vadd.f32 %v2407_v36, %v4871_v8  ;;  %v2829_v8 = vmul.f32 %v4951_v62, %v4901_v42  ;;  %v5004_v1 = vpop.permute.xlu1 %2776 }
 0x1d3   : > { %v3355_v41 = vpack.c.bf16 %v4959_v34, %v4951_v62  ;;  %v2830_v18 = vmul.f32 %v4959_v34, %v4905_v43  ;;  %5296 = vst [vmem:[#allocation8_spill] sm:$0xff] %v5004_v1 }
 0x1d4   : > { %v2854_v5 = vadd.f32 %v2853_v54, %v2827_v24  ;;  %v3350_v56 = vpack.c.bf16 %v4964_v28, %v4956_v16  ;;  %v2828_v6 = vmul.f32 %v4964_v28, %v4892_v39 }
 0x1d5   : > { %3401 = vst [vmem:[%s4915_s23 + $0x28] sm:$0xff] %v3355_v41   ;;  %v3685_v58 = vpop.f32.mrb[16].mxu1 }
 0x1d6   : > { %3400 = vst [vmem:[%s4915_s23 + $0x20] sm:$0xff] %v3350_v56   ;;  %v2855_v59 = vadd.f32 %v2854_v5, %v2828_v6  ;;  %v3801_v60 = vpop.f32.mrb[12].mxu0  ;;  %v1388_v4 = vpop.f32.mrb[17].mxu1 }
 0x1d7   : > { %v4981_v10 = vadd.f32 %v3801_v60, %v4875_v22  ;;  %v2420_v14 = vpop.f32.mrb[13].mxu0  ;;  %v3686_v15 = vpop.f32.mrb[18].mxu1 }
 0x1d8   : > { %v2856_v19 = vadd.f32 %v2855_v59, %v2829_v8  ;;  %v4986_v27 = vadd.f32 %v2420_v14, %v4879_v37  ;;  %v3802_v32 = vpop.f32.mrb[14].mxu0  ;;  %v1391_v38 = vpop.f32.mrb[19].mxu1 }
 0x1d9   : > { %v4989_v29 = vadd.f32 %v3802_v32, %v4883_v45  ;;  %v2423_v2 = vpop.f32.mrb[15].mxu0 }
 0x1da   : > { %v2831_v22 = vmul.f32 %v4986_v27, %v4923_v11  ;;  %v2857_v31 = vadd.f32 %v2856_v19, %v2830_v18  ;;  %v4994_v48 = vadd.f32 %v2423_v2, %v4885_v55  ;;  %v2833_v55 = vmul.f32 %v4981_v10, %v4944_v46  ;;  %v5022_v2 = vpop.permute.xlu0 %2781 }
 0x1db   : > { %v3365_v49 = vpack.c.bf16 %v4989_v29, %v4981_v10  ;;  %v2834_v56 = vmul.f32 %v4989_v29, %v4949_v51  ;;  %5297 = vst [vmem:[#allocation9_spill] sm:$0xff] %v5022_v2 }
 0x1dc   : > { %v2858_v37 = vadd.f32 %v2857_v31, %v2831_v22  ;;  %v3360_v63 = vpack.c.bf16 %v4994_v48, %v4986_v27  ;;  %v2832_v45 = vmul.f32 %v4994_v48, %v4929_v17 }
 0x1dd   : > { %3403 = vst [vmem:[%s4915_s23 + $0x38] sm:$0xff] %v3365_v49   ;;  %v3689_v13 = vpop.f32.mrb[20].mxu1  ;;  %v5030_v49 = vpop.permute.xlu1 %2786 }
 0x1de   : > { %3402 = vst [vmem:[%s4915_s23 + $0x30] sm:$0xff] %v3360_v63   ;;  %v2859_v30 = vadd.f32 %v2858_v37, %v2832_v45  ;;  %v3805_v36 = vpop.f32.mrb[16].mxu0  ;;  %v1404_v24 = vpop.f32.mrb[21].mxu1  ;;  %5298 = vst [vmem:[#allocation10_spill] sm:$0xff] %v5030_v49 }
 0x1df   : > { %v5010_v54 = vadd.f32 %v3805_v36, %v3685_v58  ;;  %v2436_v41 = vpop.f32.mrb[17].mxu0  ;;  %v3690_v5 = vpop.f32.mrb[22].mxu1 }
 0x1e0   : > { %v2860_v6 = vadd.f32 %v2859_v30, %v2833_v55  ;;  %v5014_v8 = vadd.f32 %v2436_v41, %v1388_v4  ;;  %v3806_v59 = vpop.f32.mrb[18].mxu0  ;;  %v1407_v60 = vpop.f32.mrb[23].mxu1 }
 0x1e1   : > { %v5016_v14 = vadd.f32 %v3806_v59, %v3686_v15  ;;  %v2439_v18 = vpop.f32.mrb[19].mxu0 }
 0x1e2   : > { %v2835_v19 = vmul.f32 %v5014_v8, %v4968_v44  ;;  %v2861_v58 = vadd.f32 %v2860_v6, %v2834_v56  ;;  %v5020_v32 = vadd.f32 %v2439_v18, %v1391_v38  ;;  %v2837_v38 = vmul.f32 %v5010_v54, %v4998_v50 }
 0x1e3   : > { %v3375_v22 = vpack.c.bf16 %v5016_v14, %v5010_v54  ;;  %v2838_v56 = vmul.f32 %v5016_v14, %v5004_v1 }
 0x1e4   : > { %v2862_v31 = vadd.f32 %v2861_v58, %v2835_v19  ;;  %v3370_v4 = vpack.c.bf16 %v5020_v32, %v5014_v8  ;;  %v2836_v15 = vmul.f32 %v5020_v32, %v4974_v57  ;;  %v5042_v58 = vpop.permute.xlu0 %2791 }
 0x1e5   : > { %3405 = vst [vmem:[%s4915_s23 + $0x48] sm:$0xff] %v3375_v22   ;;  %v3693_v37 = vpop.f32.mrb[24].mxu1  ;;  %5299 = vst [vmem:[#allocation11_spill] sm:$0xff] %v5042_v58 }
 0x1e6   : > { %3404 = vst [vmem:[%s4915_s23 + $0x40] sm:$0xff] %v3370_v4   ;;  %v2863_v63 = vadd.f32 %v2862_v31, %v2836_v15  ;;  %v3809_v45 = vpop.f32.mrb[20].mxu0  ;;  %v1420_v55 = vpop.f32.mrb[25].mxu1 }
 0x1e7   : > { %v5036_v30 = vadd.f32 %v3809_v45, %v3689_v13  ;;  %v2452_v36 = vpop.f32.mrb[21].mxu0  ;;  %v3694_v41 = vpop.f32.mrb[26].mxu1 }
 0x1e8   : > { %v2864_v6 = vadd.f32 %v2863_v63, %v2837_v38  ;;  %v5040_v59 = vadd.f32 %v2452_v36, %v1404_v24  ;;  %v3810_v18 = vpop.f32.mrb[22].mxu0  ;;  %v1423_v19 = vpop.f32.mrb[27].mxu1 }
 0x1e9   : > { %v5044_v22 = vadd.f32 %v3810_v18, %v3690_v5  ;;  %v2455_v31 = vpop.f32.mrb[23].mxu0  ;;  %v5050_v45 = vpop.permute.xlu1 %2796  ;;  %v2841_v36 = vmul.f32 %v5036_v30, %v5042_v58 }
 0x1ea   : > { %v2839_v13 = vmul.f32 %v5040_v59, %v5022_v2  ;;  %v2865_v4 = vadd.f32 %v2864_v6, %v2838_v56  ;;  %v5048_v15 = vadd.f32 %v2455_v31, %v1407_v60  ;;  %5300 = vst [vmem:[#allocation12_spill] sm:$0xff] %v5050_v45  ;;  %v5062_v6 = vpop.permute.xlu0 %2801 }
 0x1eb   : > { %v3385_v24 = vpack.c.bf16 %v5044_v22, %v5036_v30  ;;  %5301 = vst [vmem:[#allocation13_spill] sm:$0xff] %v5062_v6 }
 0x1ec   : > { %v2866_v38 = vadd.f32 %v2865_v4, %v2839_v13  ;;  %v3380_v63 = vpack.c.bf16 %v5048_v15, %v5040_v59  ;;  %v2840_v5 = vmul.f32 %v5048_v15, %v5030_v49  ;;  %v2842_v13 = vmul.f32 %v5044_v22, %v5050_v45 }
 0x1ed   : > { %3407 = vst [vmem:[%s4915_s23 + $0x58] sm:$0xff] %v3385_v24   ;;  %v5072_v24 = vpop.permute.xlu1 %2806 }
 0x1ee   : > { %3406 = vst [vmem:[%s4915_s23 + $0x50] sm:$0xff] %v3380_v63   ;;  %v2867_v60 = vadd.f32 %v2866_v38, %v2840_v5  ;;  %v3813_v56 = vpop.f32.mrb[24].mxu0  ;;  %5302 = vst [vmem:[#allocation14_spill] sm:$0xff] %v5072_v24 }
 0x1ef   : > { %v5064_v18 = vadd.f32 %v3813_v56, %v3693_v37  ;;  %v2468_v31 = vpop.f32.mrb[25].mxu0 }
 0x1f0   : > { %v2868_v4 = vadd.f32 %v2867_v60, %v2841_v36  ;;  %v5068_v2 = vadd.f32 %v2468_v31, %v1420_v55  ;;  %v3814_v1 = vpop.f32.mrb[26].mxu0 }
 0x1f1   : > { %v5074_v38 = vadd.f32 %v3814_v1, %v3694_v41  ;;  %v2471_v63 = vpop.f32.mrb[27].mxu0 }
 0x1f2   : > { %v2843_v37 = vmul.f32 %v5068_v2, %v5062_v6  ;;  %v2869_v5 = vadd.f32 %v2868_v4, %v2842_v13  ;;  %v5078_v56 = vadd.f32 %v2471_v63, %v1423_v19  ;;  %v5093_v19 = vpop.permute.xlu0 %2811  ;;  %v5099_v13 = vpop.permute.xlu1 %2816 }
 0x1f3   : > { %v3395_v55 = vpack.c.bf16 %v5074_v38, %v5064_v18  ;;  %v2845_v60 = vmul.f32 %v5064_v18, %v5093_v19 }
 0x1f4   : > { %v2870_v36 = vadd.f32 %v2869_v5, %v2843_v37  ;;  %v3390_v1 = vpack.c.bf16 %v5078_v56, %v5068_v2  ;;  %v2844_v41 = vmul.f32 %v5078_v56, %v5072_v24 }
 0x1f5   : > { %3409 = vst [vmem:[%s4915_s23 + $0x68] sm:$0xff] %v3395_v55  }
 0x1f6   : > { %3408 = vst [vmem:[%s4915_s23 + $0x60] sm:$0xff] %v3390_v1   ;;  %v2871_v31 = vadd.f32 %v2870_v36, %v2844_v41 }
 0x1f7   : > { %4116 = shalt.err (!%p4113_p3)
}
 0x1f8   : > { %s4117_s11 = scalar_lea.hbm %s5091_s5, 1792  ;;  %s4121_s20 = scalar_lea.hbm %s5285_s3, 3584 }
 0x1f9   : > { %p4118_p4 = scmp.ne.s32.totalorder %s5091_s5, %s4117_s11  ;;  %p4122_p9 = scmp.lt.u32.totalorder %s5091_s5, %s5285_s3 }
 0x1fa   : > { %p4123_p10 = scmp.lt.u32.totalorder %s4121_s20, %s4117_s11  ;;  %p4125_p12 = scmp.lt.u32.totalorder %s4117_s11, %s5091_s5 }
 0x1fb   : > { %p4119_p7 = pnand %p4118_p4, %p4267_p5 }
 0x1fc   : > { %p4124_p11 = por %p4123_p10, %p4122_p9 }
 0x1fd   : > { %p4120_p8 = pneg %p4119_p7 }
 0x1fe   : > { %p4126_p13 = por %p4125_p12, %p4124_p11 }
 0x200   : > { %p4127_p0 = pnand %p4126_p13, %p4120_p8 }
 0x202   : > { %4130 = shalt.err (!%p4127_p0)
}
 0x203   : > { %s4201_s27 = smov 64   ;;  %s4202_s29 = smov 4   ;;  %v2846_v4 = vmul.f32 %v5074_v38, %v5099_v13  ;;  %v2872_v63 = vadd.f32 %v2871_v31, %v2845_v60 }
 0x204   : > { %4054 = dma.vmem_to_hbm [thread:$0]  (%p4267_p5), %s5082_s28, 1792, %s5091_s5, %s3001_s6, %s4201_s27, %s4201_s27, %s4202_s29  }
 0x205   : > { %v2873_v37 = vadd.f32 %v2872_v63, %v2846_v4  ;;  %s3130_s30 = sshll.u32 %s4888_s13, 1  ;;  %s3296_s28 = sshll.u32 %s4250_s19, 5 }
 0x206   : > { %s5128_s7 = scalar_lea.vmem [#allocation4], %s3130_s30  ;;  %s5238_s9 = scalar_lea.hbm %s5286_s4, %s3296_s28 }
 0x207   : > { %v2874_v5 = vrot.slane %v2873_v37, 4  ;;  %s3035_s5 = sshll.u32 %s5128_s7, 4  ;;  %s3006_s10 = scalar_lea.sflag [#allocation5], %s4888_s13  ;;  %s5240_s5 = int_to_ptr.vmem [resolvable:$true] %s3035_s5 }
 0x208   : > { %s4131_s11 = scalar_lea.vmem %s5240_s5, 32  ;;  %s4203_s19 = smov [#allocation4]  }
 0x209   : > { %v2875_v55 = vadd.f32 %v2874_v5, %v2873_v37  ;;  %p4132_p1 = scmp.ne.s32.totalorder %s5240_s5, %s4131_s11  ;;  %s4135_s12 = sshll.u32 %s4203_s19, 4  ;;  %s4136_s12 = int_to_ptr.vmem [resolvable:$false] %s4135_s12 }
 0x20a   : > { %s4137_s14 = scalar_lea.vmem %s4136_s12, 64  ;;  %p4138_p4 = scmp.lt.s32.totalorder %s5240_s5, %s4136_s12 }
 0x20b   : > { %v2876_v36 = vrot.slane %v2875_v55, 2  ;;  %p4133_p2 = pnand %p4132_p1, %p4267_p5  ;;  %p4139_p7 = scmp.lt.s32.totalorder %s4137_s14, %s4131_s11 }
 0x20d   : > { %v2877_v1 = vadd.f32 %v2876_v36, %v2875_v55  ;;  %p4134_p3 = pneg %p4133_p2  ;;  %p4140_p8 = por %p4139_p7, %p4138_p4 }
 0x20f   : > { %v2878_v41 = vrot.slane %v2877_v1, 1  ;;  %p4141_p9 = pnand %p4140_p8, %p4134_p3 }
 0x211   : > { %v2879_v24 = vadd.f32 %v2878_v41, %v2877_v1 }
 0x213   : > { %v2880_v6 = vmul.f32 0.0051020407, %v2879_v24  ;;  %2998 = vst [vmem:[%s5128_s7] sm:$0x1] %v2879_v24 }
 0x215   : > { %v2886_v45 = vsub.f32 %v4935_v33, %v2880_v6  ;;  %v2888_v58 = vsub.f32 %v4931_v26, %v2880_v6  ;;  %v2889_v49 = vsub.f32 %v4956_v16, %v2880_v6  ;;  %v2890_v60 = vsub.f32 %v4964_v28, %v2880_v6 }
 0x216   : > { %v2891_v31 = vsub.f32 %v4951_v62, %v2880_v6  ;;  %v2892_v4 = vsub.f32 %v4959_v34, %v2880_v6  ;;  %v2893_v63 = vsub.f32 %v4986_v27, %v2880_v6  ;;  %v2894_v37 = vsub.f32 %v4994_v48, %v2880_v6 }
 0x217   : > { %v2895_v5 = vsub.f32 %v4981_v10, %v2880_v6  ;;  %v2896_v24 = vsub.f32 %v4989_v29, %v2880_v6  ;;  %v5142_v33 = vsub.f32 %v5014_v8, %v2880_v6  ;;  %v5145_v26 = vsub.f32 %v5020_v32, %v2880_v6 }
 0x218   : > { %v5148_v16 = vsub.f32 %v5010_v54, %v2880_v6  ;;  %v5151_v62 = vsub.f32 %v5016_v14, %v2880_v6  ;;  %v5154_v34 = vsub.f32 %v5040_v59, %v2880_v6  ;;  %v5157_v28 = vsub.f32 %v5048_v15, %v2880_v6 }
 0x219   : > { %v5160_v10 = vsub.f32 %v5036_v30, %v2880_v6  ;;  %v5163_v27 = vsub.f32 %v5044_v22, %v2880_v6  ;;  %v5166_v29 = vsub.f32 %v5068_v2, %v2880_v6  ;;  %v5169_v48 = vsub.f32 %v5078_v56, %v2880_v6 }
 0x21a   : > { %v2907_v54 = vsub.f32 %v5064_v18, %v2880_v6  ;;  %v2908_v8 = vsub.f32 %v5074_v38, %v2880_v6  ;;  %v2881_v14 = vsub.f32 %v4897_v25, %v2880_v6  ;;  %v2882_v32 = vsub.f32 %v4903_v53, %v2880_v6 }
 0x21b   : > { %v2883_v30 = vsub.f32 %v4895_v0, %v2880_v6  ;;  %v2884_v22 = vsub.f32 %v4899_v35, %v2880_v6  ;;  %v2885_v36 = vsub.f32 %v4927_v21, %v2880_v6  ;;  %v2887_v0 = vsub.f32 %v4921_v9, %v2880_v6 }
 0x21c   : > { %v2909_v59 = vmul.f32 %v2881_v14, %v2881_v14  ;;  %v2910_v15 = vmul.f32 %v2882_v32, %v2882_v32  ;;  %v2935_v55 = vmul.f32 %v2907_v54, %v2907_v54  ;;  %v2936_v2 = vmul.f32 %v2908_v8, %v2908_v8 }
 0x21d   : > { %v2911_v56 = vmul.f32 %v2883_v30, %v2883_v30  ;;  %v2912_v38 = vmul.f32 %v2884_v22, %v2884_v22  ;;  %v2913_v41 = vmul.f32 %v2885_v36, %v2885_v36  ;;  %v2914_v8 = vmul.f32 %v2886_v45, %v2886_v45 }
 0x21e   : > { %v2937_v1 = vmul.f32 %v2909_v59, %v4857_v3  ;;  %v2938_v18 = vmul.f32 %v2910_v15, %v4861_v47  ;;  %v5181_v25 = vmul.f32 %v2935_v55, %v5093_v19  ;;  %v5184_v53 = vmul.f32 %v2936_v2, %v5099_v13 }
 0x21f   : > { %v2939_v35 = vmul.f32 %v2911_v56, %v4859_v12  ;;  %v2940_v21 = vmul.f32 %v2912_v38, %v4863_v52  ;;  %v2915_v3 = vmul.f32 %v2887_v0, %v2887_v0  ;;  %v2941_v47 = vmul.f32 %v2913_v41, %v4869_v7 }
 0x220   : > { %v2965_v54 = vadd.f32 %v2938_v18, %v2937_v1  ;;  %v2916_v30 = vmul.f32 %v2888_v58, %v2888_v58  ;;  %v2942_v19 = vmul.f32 %v2914_v8, %v4873_v20  ;;  %v2917_v13 = vmul.f32 %v2889_v49, %v2889_v49  ;;  %v5304_v8 = vld [vmem:[#allocation9_spill] sm:$0xff] }
 0x221   : > { %v2943_v15 = vmul.f32 %v2915_v3, %v4877_v23  ;;  %v2918_v6 = vmul.f32 %v2890_v60, %v2890_v60  ;;  %v2919_v45 = vmul.f32 %v2891_v31, %v2891_v31  ;;  %v2920_v2 = vmul.f32 %v2892_v4, %v2892_v4 }
 0x222   : > { %v2966_v14 = vadd.f32 %v2965_v54, %v2939_v35  ;;  %v2944_v12 = vmul.f32 %v2916_v30, %v4881_v40  ;;  %v2945_v52 = vmul.f32 %v2917_v13, %v4890_v61  ;;  %v2921_v58 = vmul.f32 %v2893_v63, %v2893_v63  ;;  %v5303_v35 = vld [vmem:[#allocation8_spill] sm:$0xff]  ;;  %v5308_v13 = vld [vmem:[#allocation13_spill] sm:$0xff] }
 0x223   : > { %v2946_v7 = vmul.f32 %v2918_v6, %v4892_v39  ;;  %v2947_v20 = vmul.f32 %v2919_v45, %v4901_v42  ;;  %v2922_v49 = vmul.f32 %v2894_v37, %v2894_v37  ;;  %v2948_v23 = vmul.f32 %v2920_v2, %v4905_v43  ;;  %v5307_v30 = vld [vmem:[#allocation12_spill] sm:$0xff] }
 0x224   : > { %v2967_v32 = vadd.f32 %v2966_v14, %v2940_v21  ;;  %v2923_v60 = vmul.f32 %v2895_v5, %v2895_v5  ;;  %v2949_v40 = vmul.f32 %v2921_v58, %v4923_v11  ;;  %v2924_v31 = vmul.f32 %v2896_v24, %v2896_v24  ;;  %v5305_v14 = vld [vmem:[#allocation10_spill] sm:$0xff] }
 0x225   : > { %v2950_v61 = vmul.f32 %v2922_v49, %v4929_v17  ;;  %v2925_v39 = vmul.f32 %v5142_v33, %v5142_v33  ;;  %v2926_v42 = vmul.f32 %v5145_v26, %v5145_v26  ;;  %v2927_v11 = vmul.f32 %v5148_v16, %v5148_v16 }
 0x226   : > { %v2968_v59 = vadd.f32 %v2967_v32, %v2941_v47  ;;  %v2951_v4 = vmul.f32 %v2923_v60, %v4944_v46  ;;  %v2952_v43 = vmul.f32 %v2924_v31, %v4949_v51  ;;  %v2928_v17 = vmul.f32 %v5151_v62, %v5151_v62  ;;  %v5306_v47 = vld [vmem:[#allocation11_spill] sm:$0xff] }
 0x227   : > { %v2953_v5 = vmul.f32 %v2925_v39, %v4968_v44  ;;  %v2954_v33 = vmul.f32 %v2926_v42, %v4974_v57  ;;  %v2929_v46 = vmul.f32 %v5154_v34, %v5154_v34  ;;  %v2955_v26 = vmul.f32 %v2927_v11, %v4998_v50 }
 0x228   : > { %v2969_v9 = vadd.f32 %v2968_v59, %v2942_v19  ;;  %v2930_v51 = vmul.f32 %v5157_v28, %v5157_v28  ;;  %v2956_v16 = vmul.f32 %v2928_v17, %v5303_v35  ;;  %v2931_v44 = vmul.f32 %v5160_v10, %v5160_v10 }
 0x229   : > { %v2957_v62 = vmul.f32 %v2929_v46, %v5304_v8  ;;  %v2932_v57 = vmul.f32 %v5163_v27, %v5163_v27  ;;  %v2933_v50 = vmul.f32 %v5166_v29, %v5166_v29  ;;  %v2934_v10 = vmul.f32 %v5169_v48, %v5169_v48 }
 0x22a   : > { %v2970_v22 = vadd.f32 %v2969_v9, %v2943_v15  ;;  %v2958_v34 = vmul.f32 %v2930_v51, %v5305_v14  ;;  %v2959_v28 = vmul.f32 %v2931_v44, %v5306_v47  ;;  %v5309_v9 = vld [vmem:[#allocation14_spill] sm:$0xff] }
 0x22b   : > { %v2960_v19 = vmul.f32 %v2932_v57, %v5307_v30  ;;  %v2961_v15 = vmul.f32 %v2933_v50, %v5308_v13  ;;  %v2962_v6 = vmul.f32 %v2934_v10, %v5309_v9 }
 0x22c   : > { %v2971_v55 = vadd.f32 %v2970_v22, %v2944_v12 }
 0x22e   : > { %v2972_v36 = vadd.f32 %v2971_v55, %v2945_v52 }
 0x230   : > { %v2973_v56 = vadd.f32 %v2972_v36, %v2946_v7 }
 0x232   : > { %v2974_v1 = vadd.f32 %v2973_v56, %v2947_v20 }
 0x234   : > { %v2975_v18 = vadd.f32 %v2974_v1, %v2948_v23 }
 0x236   : > { %v2976_v38 = vadd.f32 %v2975_v18, %v2949_v40 }
 0x238   : > { %v2977_v63 = vadd.f32 %v2976_v38, %v2950_v61 }
 0x23a   : > { %v2978_v37 = vadd.f32 %v2977_v63, %v2951_v4 }
 0x23c   : > { %v2979_v24 = vadd.f32 %v2978_v37, %v2952_v43 }
 0x23e   : > { %v2980_v0 = vadd.f32 %v2979_v24, %v2953_v5 }
 0x240   : > { %v2981_v41 = vadd.f32 %v2980_v0, %v2954_v33 }
 0x242   : > { %v2982_v54 = vadd.f32 %v2981_v41, %v2955_v26 }
 0x244   : > { %v2983_v21 = vadd.f32 %v2982_v54, %v2956_v16 }
 0x246   : > { %v2984_v3 = vadd.f32 %v2983_v21, %v2957_v62 }
 0x248   : > { %v2985_v32 = vadd.f32 %v2984_v3, %v2958_v34 }
 0x24a   : > { %v2986_v59 = vadd.f32 %v2985_v32, %v2959_v28 }
 0x24c   : > { %v2987_v27 = vadd.f32 %v2986_v59, %v2960_v19 }
 0x24e   : > { %v2988_v12 = vadd.f32 %v2987_v27, %v2961_v15 }
 0x250   : > { %v2989_v29 = vadd.f32 %v2988_v12, %v2962_v6 }
 0x252   : > { %v2990_v22 = vadd.f32 %v2989_v29, %v5181_v25 }
 0x254   : > { %v2991_v45 = vadd.f32 %v2990_v22, %v5184_v53 }
 0x256   : > { %v2992_v52 = vrot.slane %v2991_v45, 4 }
 0x258   : > { %v2993_v55 = vadd.f32 %v2992_v52, %v2991_v45 }
 0x25a   : > { %v2994_v48 = vrot.slane %v2993_v55, 2 }
 0x25c   : > { %v2995_v2 = vadd.f32 %v2994_v48, %v2993_v55 }
 0x25e   : > { %v2996_v7 = vrot.slane %v2995_v2, 1 }
 0x260   : > { %v2997_v36 = vadd.f32 %v2996_v7, %v2995_v2 }
 0x262   : > { %2999 = vst [vmem:[%s5128_s7 + $0x1] sm:$0x1] %v2997_v36 }
 0x263   : > { %4144 = shalt.err (!%p4141_p9)
}
 0x264   : > { %s4145_s13 = scalar_lea.hbm %s5238_s9, 32  ;;  %s4149_s23 = scalar_lea.hbm %s5286_s4, 64 }
 0x265   : > { %p4146_p10 = scmp.ne.s32.totalorder %s5238_s9, %s4145_s13  ;;  %p4150_p13 = scmp.lt.u32.totalorder %s5238_s9, %s5286_s4 }
 0x266   : > { %p4151_p0 = scmp.lt.u32.totalorder %s4149_s23, %s4145_s13  ;;  %p4153_p2 = scmp.lt.u32.totalorder %s4145_s13, %s5238_s9 }
 0x267   : > { %p4147_p11 = pnand %p4146_p10, %p4267_p5 }
 0x268   : > { %p4152_p1 = por %p4151_p0, %p4150_p13 }
 0x269   : > { %p4148_p12 = pneg %p4147_p11 }
 0x26a   : > { %p4154_p3 = por %p4153_p2, %p4152_p1 }
 0x26c   : > { %p4155_p4 = pnand %p4154_p3, %p4148_p12 }
 0x26e   : > { %4158 = shalt.err (!%p4155_p4)
}
 0x26f   : > { %4055 = dma.vmem_to_hbm [thread:$0]  (%p4267_p5), %s5240_s5, 32, %s5238_s9, %s3006_s10  }
 0x270 PF: > { %p4065_p7 = scmp.ge.s32.totalorder %s4197_s18, 2  ;;  %s3047_s30 = sand.u32 1, %s4185_s15  }
 0x271   : > { %s3048_s7 = scalar_lea.sflag [#allocation3], %s3047_s30 }
 0x272   : > { %p4059_p8 = pnand %p4065_p7, %p4271_p6 }
 0x274   : > { %4176 = dma.done.wait (!%p4059_p8), %s3048_s7, 1792  }
 0x275   : > { %4178 = vsyncadd (!%p4059_p8), %s3048_s7, 4294965504  ;;  %s3057_s28 = scalar_lea.sflag [#allocation5], %s3047_s30 }
 0x276   : > { %4180 = dma.done.wait (!%p4059_p8), %s3057_s28, 32  }
 0x277   : > { %4182 = vsyncadd (!%p4059_p8), %s3057_s28, 4294967264  ;;  %p18_p5 = scmp.ge.s32.totalorder %s4254_s21, 4   ;;  %s5310_s15 = smov %s4189_s16 }
 0x278   : > { %s5311_s16 = smov %s4193_s17  ;;  %s5312_s17 = smov %s4265_s24 }
 0x279   : > { %s5313_s18 = smov %s4254_s21  ;;  %20 = sbr.rel (!%p18_p5) target bundleno = 5 (0x5), region = 92 }
 0x280   :  { %3062 = vsyncpa [#allocation3], 1 }
 0x281   :  { %3064 = vsyncpa [#allocation3 + $0x1], 1 }
 0x282   :  { %3065 = vsyncpa [#allocation5], 1 }
 0x283   :  { %3067 = vsyncpa [#allocation5 + $0x1], 1 }

</bundles_post_ra>
